<compile_context>
chip_gen: v7x
topology: tpu7x:2x2x1
jax: 0.10.0
libtpu: 0.0.40
codegen_flags: <defaults>
</compile_context>

<pallas_src>
import functools

import jax
import jax.numpy as jnp
from jax import lax
from jax.experimental import pallas as pl
from jax.experimental.pallas import tpu as pltpu

EPS_LN = 1e-6
NEG_BIG = -1e30  # finite "minus infinity" for masking (avoids NaN from exp(-inf - -inf))


# --------------------------------------------------------------------------------------
# Fused kernel. grid = (B, num_q_tiles); one (batch, q-tile) per step.
#   xq_ref  : (1, TQ, D)  query rows of x (also the residual rows)
#   xkv_ref : (1, T, D)   full sequence of x for K/V (re-DMA'd only when b changes)
#   kpm_ref : (1, 1, T)   key padding mask, 1.0 = padded key
#   wq_ref  : (D, D)      bf16 Wq          bq_ref : (1, D)  f32
#   wkv_ref : (D, 2D)     bf16 [Wk|Wv]     bkv_ref: (1, 2D) f32
#   wo_ref  : (D, D)      bf16 Wo          bo_ref : (1, D)  f32
#   g_ref/b_ref : (1, D)  LayerNorm gamma/beta
#   o_ref   : (1, TQ, D)  output
#   kv_s    : (T, 2D) bf16 VMEM scratch (cached K|V for the current batch element)
#   ctx_s   : (TQ, D) f32 VMEM scratch (concatenated per-head contexts)
# --------------------------------------------------------------------------------------
def self_attn_block_kernel(xq_ref, xkv_ref, kpm_ref, wq_ref, bq_ref, wkv_ref, bkv_ref,
                           wo_ref, bo_ref, g_ref, b_ref, o_ref, kv_s, ctx_s,
                           *, num_heads, scaling):
    qi = pl.program_id(1)
    TQ, D = xq_ref.shape[1], xq_ref.shape[2]
    T = xkv_ref.shape[1]
    hd = D // num_heads

    # K/V projection: once per batch element, cached in bf16 VMEM across q-tiles.
    @pl.when(qi == 0)
    def _():
        xkv = xkv_ref[0].astype(jnp.bfloat16)                                   # (T, D)
        kv = jnp.dot(xkv, wkv_ref[...],
                     preferred_element_type=jnp.float32) + bkv_ref[...]          # (T, 2D) f32
        kv_s[...] = kv.astype(jnp.bfloat16)

    # Q projection for this q-tile; head_dim**-0.5 applied in f32, then bf16 for the MXU.
    x_q = xq_ref[0]                                                              # (TQ, D) f32
    q = (jnp.dot(x_q.astype(jnp.bfloat16), wq_ref[...],
                 preferred_element_type=jnp.float32) + bq_ref[...]) * scaling
    q = q.astype(jnp.bfloat16)

    # Fused causal (mask_future) + key-padding mask for this q-tile: one boolean tensor.
    row = qi * TQ + lax.broadcasted_iota(jnp.int32, (TQ, T), 0)
    col = lax.broadcasted_iota(jnp.int32, (TQ, T), 1)
    masked = jnp.logical_or(col > row, kpm_ref[0] > 0.5)                         # (TQ, T)

    # Per-head attention; contexts written into ctx_s, one out-projection matmul after.
    for h in range(num_heads):
        q_h = q[:, h * hd:(h + 1) * hd]                                          # (TQ, hd) bf16
        k_h = kv_s[:, h * hd:(h + 1) * hd]                                       # (T, hd)  bf16
        v_h = kv_s[:, D + h * hd:D + (h + 1) * hd]                               # (T, hd)  bf16
        s = lax.dot_general(q_h, k_h, (((1,), (1,)), ((), ())),
                            preferred_element_type=jnp.float32)                  # (TQ, T) f32
        s = jnp.where(masked, NEG_BIG, s)
        m = jnp.max(s, axis=-1, keepdims=True)
        e = jnp.exp(s - m)
        p = (e * pl.reciprocal(jnp.sum(e, axis=-1, keepdims=True), approx=True)
             ).astype(jnp.bfloat16)
        ctx_s[:, h * hd:(h + 1) * hd] = jnp.dot(p, v_h,
                                                preferred_element_type=jnp.float32)

    # Single out-projection: full K=D contraction on the MXU.
    attn_out = jnp.dot(ctx_s[...].astype(jnp.bfloat16), wo_ref[...],
                       preferred_element_type=jnp.float32) + bo_ref[...]         # (TQ, D)

    # Dropout (eval) = identity; ResidualBlock: residual + attn_out; post-LN (unbiased std).
    y = x_q + attn_out
    mean = jnp.mean(y, axis=-1, keepdims=True)
    c = y - mean
    var = jnp.sum(c * c, axis=-1, keepdims=True) / (D - 1)
    o_ref[0] = g_ref[...] * c / (jnp.sqrt(var) + EPS_LN) + b_ref[...]


# --------------------------------------------------------------------------------------
# Wrapper: time-major (T, B, D) in/out, one pallas_call per forward.
# --------------------------------------------------------------------------------------
def self_attention_block_forward(params, x, padding_mask, *, num_heads, q_tile=256):
    T, B, D = x.shape
    assert D % num_heads == 0
    hd = D // num_heads
    scaling = float(hd) ** -0.5

    TQ = q_tile if (T % q_tile == 0) else T      # TODO(synk): pad/mask partial q-tiles
    TQ = min(TQ, T)
    NQ = T // TQ

    # Layout plumbing (tiny here): batch-major blocks for lane-dense (TQ, D) tiles per step.
    x_b = jnp.transpose(x, (1, 0, 2))                          # (B, T, D)
    kpm = padding_mask.astype(jnp.float32).reshape(B, 1, T)    # (B, 1, T), 1.0 = padded key

    # bf16 weights (MXU-native, half the weight DMA); biases stay f32.
    wq = params["wq"].astype(jnp.bfloat16)
    wkv = jnp.concatenate([params["wk"], params["wv"]], axis=1).astype(jnp.bfloat16)
    wo = params["wo"].astype(jnp.bfloat16)
    bq = params["bq"]
    bkv = jnp.concatenate([params["bk"], params["bv"]], axis=1)

    out = pl.pallas_call(
        functools.partial(self_attn_block_kernel, num_heads=num_heads, scaling=scaling),
        grid=(B, NQ),
        out_shape=jax.ShapeDtypeStruct((B, T, D), jnp.float32),
        in_specs=[
            pl.BlockSpec((1, TQ, D), lambda b, q: (b, q, 0)),      # x: query/residual rows
            pl.BlockSpec((1, T, D), lambda b, q: (b, 0, 0)),       # x: full seq for K/V
            pl.BlockSpec((1, 1, T), lambda b, q: (b, 0, 0)),       # key padding mask
            pl.BlockSpec((D, D), lambda b, q: (0, 0)),             # wq (bf16)
            pl.BlockSpec((1, D), lambda b, q: (0, 0)),             # bq
            pl.BlockSpec((D, 2 * D), lambda b, q: (0, 0)),         # wkv (bf16)
            pl.BlockSpec((1, 2 * D), lambda b, q: (0, 0)),         # bkv
            pl.BlockSpec((D, D), lambda b, q: (0, 0)),             # wo (bf16)
            pl.BlockSpec((1, D), lambda b, q: (0, 0)),             # bo
            pl.BlockSpec((1, D), lambda b, q: (0, 0)),             # ln gamma
            pl.BlockSpec((1, D), lambda b, q: (0, 0)),             # ln beta
        ],
        out_specs=pl.BlockSpec((1, TQ, D), lambda b, q: (b, q, 0)),
        scratch_shapes=[
            pltpu.VMEM((T, 2 * D), jnp.bfloat16),                  # cached K|V per batch elem
            pltpu.VMEM((TQ, D), jnp.float32),                      # concatenated head contexts
        ],
        compiler_params=pltpu.CompilerParams(
            # batch sharded across TCs (v7x megacore); q-tiles sequential so the K/V scratch
            # (written at qi==0) is valid across the tile loop.
            dimension_semantics=("parallel", "arbitrary"),
            vmem_limit_bytes=48 * 1024 * 1024),
    )(x_b, x_b, kpm, wq, bq, wkv, bkv, wo, params["bo"], params["ln_g"], params["ln_b"])

    return jnp.transpose(out, (1, 0, 2))                           # back to (T, B, D)


# --------------------------------------------------------------------------------------
# Deterministic parameter construction (shapes from SelfAttentionBlock.__init__)
# --------------------------------------------------------------------------------------
def make_params(key, input_dim):
    D = input_dim

    def nrm(k, shape):
        return jax.random.normal(k, shape, dtype=jnp.float32) * 0.1

    keys = iter(jax.random.split(key, 16))
    return {
        "wq": nrm(next(keys), (D, D)), "bq": nrm(next(keys), (1, D)),
        "wk": nrm(next(keys), (D, D)), "bk": nrm(next(keys), (1, D)),
        "wv": nrm(next(keys), (D, D)), "bv": nrm(next(keys), (1, D)),
        "wo": nrm(next(keys), (D, D)), "bo": nrm(next(keys), (1, D)),
        "ln_g": jnp.ones((1, D), jnp.float32),
        "ln_b": jnp.zeros((1, D), jnp.float32),
    }


if __name__ == "__main__":
    # small shapes: input_dim=32, num_heads=8, seq=8, batch=2
    D, NH, T, B = 32, 8, 8, 2

    root = jax.random.PRNGKey(0)
    kp, kx = jax.random.split(root, 2)
    params = make_params(kp, D)

    x = jax.random.normal(kx, (T, B, D), dtype=jnp.float32)      # (seq_len, batch, depth)
    lengths = jnp.array([T, 5], dtype=jnp.int32)
    # PyTorch key_padding_mask convention: True / nonzero = padded position to ignore.
    padding_mask = (jnp.arange(T)[None, :] >= lengths[:, None])  # (B, T) bool

    fwd = jax.jit(functools.partial(self_attention_block_forward, num_heads=NH))
    out = fwd(params, x, padding_mask)
    jax.block_until_ready(out)
    assert out.shape == (T, B, D)
    assert bool(jnp.all(jnp.isfinite(out)))
    print("KERNEL_OK")
</pallas_src>

<mosaic_0001>
module attributes {stable_mosaic.version = 11 : i64} {
  func.func @self_attn_block_kernel(%arg0: i32, %arg1: i32, %arg2: memref<1x8x32xf32, #tpu.memory_space<vmem>>, %arg3: memref<1x8x32xf32, #tpu.memory_space<vmem>>, %arg4: memref<1x1x8xf32, #tpu.memory_space<vmem>>, %arg5: memref<32x32xbf16, #tpu.memory_space<vmem>>, %arg6: memref<1x32xf32, #tpu.memory_space<vmem>>, %arg7: memref<32x64xbf16, #tpu.memory_space<vmem>>, %arg8: memref<1x64xf32, #tpu.memory_space<vmem>>, %arg9: memref<32x32xbf16, #tpu.memory_space<vmem>>, %arg10: memref<1x32xf32, #tpu.memory_space<vmem>>, %arg11: memref<1x32xf32, #tpu.memory_space<vmem>>, %arg12: memref<1x32xf32, #tpu.memory_space<vmem>>, %arg13: memref<1x8x32xf32, #tpu.memory_space<vmem>>, %arg14: memref<8x64xbf16, #tpu.memory_space<vmem>>, %arg15: memref<8x32xf32, #tpu.memory_space<vmem>>) attributes {dimension_semantics = [#tpu.dimension_semantics<parallel>, #tpu.dimension_semantics<arbitrary>], iteration_bounds = array<i64: 2, 1>, scalar_prefetch = 0 : i64, scratch_operands = 2 : i64, tpu.core_type = #tpu.core_type<tc>, window_params = [{transform_indices = @transform_0, window_bounds = array<i64: 1, 8, 32>}, {transform_indices = @transform_1, window_bounds = array<i64: 1, 8, 32>}, {transform_indices = @transform_2, window_bounds = array<i64: 1, 1, 8>}, {pipeline_mode = #tpu.pipeline_mode<synchronous>, transform_indices = @transform_3, window_bounds = array<i64: 32, 32>}, {pipeline_mode = #tpu.pipeline_mode<synchronous>, transform_indices = @transform_4, window_bounds = array<i64: 1, 32>}, {pipeline_mode = #tpu.pipeline_mode<synchronous>, transform_indices = @transform_5, window_bounds = array<i64: 32, 64>}, {pipeline_mode = #tpu.pipeline_mode<synchronous>, transform_indices = @transform_6, window_bounds = array<i64: 1, 64>}, {pipeline_mode = #tpu.pipeline_mode<synchronous>, transform_indices = @transform_7, window_bounds = array<i64: 32, 32>}, {pipeline_mode = #tpu.pipeline_mode<synchronous>, transform_indices = @transform_8, window_bounds = array<i64: 1, 32>}, {pipeline_mode = #tpu.pipeline_mode<synchronous>, transform_indices = @transform_9, window_bounds = array<i64: 1, 32>}, {pipeline_mode = #tpu.pipeline_mode<synchronous>, transform_indices = @transform_10, window_bounds = array<i64: 1, 32>}, {transform_indices = @transform_11, window_bounds = array<i64: 1, 8, 32>}]} {
    %c0_i32 = arith.constant 0 : i32
    %0 = arith.cmpi eq, %arg1, %c0_i32 : i32
    %1 = arith.extui %0 : i1 to i32
    %c0_i32_0 = arith.constant 0 : i32
    %2 = arith.cmpi ne, %1, %c0_i32_0 : i32
    scf.if %2 {
      %c0_104 = arith.constant 0 : index
      %c0_105 = arith.constant 0 : index
      %c0_106 = arith.constant 0 : index
      %211 = vector.load %arg3[%c0_104, %c0_105, %c0_106] : memref<1x8x32xf32, #tpu.memory_space<vmem>>, vector<1x8x32xf32>
      %212 = vector.shape_cast %211 : vector<1x8x32xf32> to vector<8x32xf32>
      %213 = arith.truncf %212 : vector<8x32xf32> to vector<8x32xbf16>
      %c0_107 = arith.constant 0 : index
      %c0_108 = arith.constant 0 : index
      %214 = vector.load %arg7[%c0_107, %c0_108] : memref<32x64xbf16, #tpu.memory_space<vmem>>, vector<32x64xbf16>
      %cst_109 = arith.constant dense<0.000000e+00> : vector<8x64xf32>
      %215 = tpu.matmul %213, %214, %cst_109 {dimension_numbers = #tpu.dot_dimension_numbers<[1], [0], [0], [1], [0, 0, 1, 1], [], []>} : vector<8x32xbf16>, vector<32x64xbf16>, vector<8x64xf32> -> vector<8x64xf32>
      %c0_110 = arith.constant 0 : index
      %c0_111 = arith.constant 0 : index
      %216 = vector.load %arg8[%c0_110, %c0_111] : memref<1x64xf32, #tpu.memory_space<vmem>>, vector<1x64xf32>
      %217 = vector.broadcast %216 : vector<1x64xf32> to vector<8x64xf32>
      %218 = arith.addf %215, %217 : vector<8x64xf32>
      %219 = arith.truncf %218 : vector<8x64xf32> to vector<8x64xbf16>
      %c0_112 = arith.constant 0 : index
      %c0_113 = arith.constant 0 : index
      %220 = vector.load %arg14[%c0_112, %c0_113] : memref<8x64xbf16, #tpu.memory_space<vmem>>, vector<8x64xbf16>
      tpu.vector_store %arg14[%c0_112, %c0_113], %219 {strides = array<i32>} : memref<8x64xbf16, #tpu.memory_space<vmem>>, vector<8x64xbf16>,
    } else {
    }
    %c0 = arith.constant 0 : index
    %c0_1 = arith.constant 0 : index
    %c0_2 = arith.constant 0 : index
    %3 = vector.load %arg2[%c0, %c0_1, %c0_2] : memref<1x8x32xf32, #tpu.memory_space<vmem>>, vector<1x8x32xf32>
    %4 = vector.shape_cast %3 : vector<1x8x32xf32> to vector<8x32xf32>
    %5 = arith.truncf %4 : vector<8x32xf32> to vector<8x32xbf16>
    %c0_3 = arith.constant 0 : index
    %c0_4 = arith.constant 0 : index
    %6 = vector.load %arg5[%c0_3, %c0_4] : memref<32x32xbf16, #tpu.memory_space<vmem>>, vector<32x32xbf16>
    %cst = arith.constant dense<0.000000e+00> : vector<8x32xf32>
    %7 = tpu.matmul %5, %6, %cst {dimension_numbers = #tpu.dot_dimension_numbers<[1], [0], [0], [1], [0, 0, 1, 1], [], []>} : vector<8x32xbf16>, vector<32x32xbf16>, vector<8x32xf32> -> vector<8x32xf32>
    %c0_5 = arith.constant 0 : index
    %c0_6 = arith.constant 0 : index
    %8 = vector.load %arg6[%c0_5, %c0_6] : memref<1x32xf32, #tpu.memory_space<vmem>>, vector<1x32xf32>
    %9 = vector.broadcast %8 : vector<1x32xf32> to vector<8x32xf32>
    %10 = arith.addf %7, %9 : vector<8x32xf32>
    %cst_7 = arith.constant 5.000000e-01 : f32
    %11 = vector.broadcast %cst_7 : f32 to vector<8x32xf32>
    %12 = arith.mulf %10, %11 : vector<8x32xf32>
    %13 = arith.truncf %12 : vector<8x32xf32> to vector<8x32xbf16>
    %c8_i32 = arith.constant 8 : i32
    %14 = arith.muli %arg1, %c8_i32 : i32
    %15 = tpu.iota {dimensions = array<i32: 0>} : vector<8x8xi32>
    %16 = vector.broadcast %14 : i32 to vector<8x8xi32>
    %17 = arith.addi %16, %15 : vector<8x8xi32>
    %18 = tpu.iota {dimensions = array<i32: 1>} : vector<8x8xi32>
    %19 = arith.cmpi sgt, %18, %17 : vector<8x8xi32>
    %c0_8 = arith.constant 0 : index
    %c0_9 = arith.constant 0 : index
    %c0_10 = arith.constant 0 : index
    %20 = vector.load %arg4[%c0_8, %c0_9, %c0_10] : memref<1x1x8xf32, #tpu.memory_space<vmem>>, vector<1x1x8xf32>
    %21 = vector.shape_cast %20 : vector<1x1x8xf32> to vector<1x8xf32>
    %cst_11 = arith.constant 5.000000e-01 : f32
    %22 = vector.broadcast %cst_11 : f32 to vector<1x8xf32>
    %23 = arith.cmpf ogt, %21, %22 : vector<1x8xf32>
    %24 = vector.broadcast %23 : vector<1x8xi1> to vector<8x8xi1>
    %25 = arith.ori %19, %24 : vector<8x8xi1>
    %26 = vector.extract_strided_slice %13 {offsets = [0, 0], sizes = [8, 4], strides = [1, 1]} : vector<8x32xbf16> to vector<8x4xbf16>
    %c0_12 = arith.constant 0 : index
    %c0_13 = arith.constant 0 : index
    %27 = vector.load %arg14[%c0_12, %c0_13] : memref<8x64xbf16, #tpu.memory_space<vmem>>, vector<8x4xbf16>
    %c0_14 = arith.constant 0 : index
    %c32 = arith.constant 32 : index
    %28 = vector.load %arg14[%c0_14, %c32] : memref<8x64xbf16, #tpu.memory_space<vmem>>, vector<8x4xbf16>
    %cst_15 = arith.constant dense<0.000000e+00> : vector<8x8xf32>
    %29 = tpu.matmul %26, %27, %cst_15 {dimension_numbers = #tpu.dot_dimension_numbers<[1], [1], [0], [0], [0, 0, 1, 0], [], []>} : vector<8x4xbf16>, vector<8x4xbf16>, vector<8x8xf32> -> vector<8x8xf32>
    %cst_16 = arith.constant -1.000000e+30 : f32
    %30 = vector.broadcast %cst_16 : f32 to vector<8x8xf32>
    %31 = arith.select %25, %30, %29 : vector<8x8xi1>, vector<8x8xf32>
    %cst_17 = arith.constant dense<0xFF800000> : vector<8xf32>
    %32 = vector.multi_reduction <maximumf>, %31, %cst_17 [1] : vector<8x8xf32> to vector<8xf32>
    %33 = vector.shape_cast %32 : vector<8xf32> to vector<8x1xf32>
    %34 = vector.broadcast %33 : vector<8x1xf32> to vector<8x8xf32>
    %35 = arith.subf %31, %34 : vector<8x8xf32>
    %36 = math.exp %35 : vector<8x8xf32>
    %cst_18 = arith.constant dense<0.000000e+00> : vector<8xf32>
    %37 = vector.multi_reduction <add>, %36, %cst_18 [1] : vector<8x8xf32> to vector<8xf32>
    %38 = vector.shape_cast %37 : vector<8xf32> to vector<8x1xf32>
    %39 = tpu.reciprocal %38 {approx = true} : vector<8x1xf32> -> vector<8x1xf32>
    %40 = vector.broadcast %39 : vector<8x1xf32> to vector<8x8xf32>
    %41 = arith.mulf %36, %40 : vector<8x8xf32>
    %42 = arith.truncf %41 : vector<8x8xf32> to vector<8x8xbf16>
    %cst_19 = arith.constant dense<0.000000e+00> : vector<8x4xf32>
    %43 = tpu.matmul %42, %28, %cst_19 {dimension_numbers = #tpu.dot_dimension_numbers<[1], [0], [0], [1], [0, 0, 1, 1], [], []>} : vector<8x8xbf16>, vector<8x4xbf16>, vector<8x4xf32> -> vector<8x4xf32>
    %c0_20 = arith.constant 0 : index
    %c0_21 = arith.constant 0 : index
    %44 = vector.load %arg15[%c0_20, %c0_21] : memref<8x32xf32, #tpu.memory_space<vmem>>, vector<8x4xf32>
    tpu.vector_store %arg15[%c0_20, %c0_21], %43 {strides = array<i32>} : memref<8x32xf32, #tpu.memory_space<vmem>>, vector<8x4xf32>,
    %45 = vector.extract_strided_slice %13 {offsets = [0, 4], sizes = [8, 4], strides = [1, 1]} : vector<8x32xbf16> to vector<8x4xbf16>
    %c0_22 = arith.constant 0 : index
    %c4 = arith.constant 4 : index
    %46 = vector.load %arg14[%c0_22, %c4] : memref<8x64xbf16, #tpu.memory_space<vmem>>, vector<8x4xbf16>
    %c0_23 = arith.constant 0 : index
    %c36 = arith.constant 36 : index
    %47 = vector.load %arg14[%c0_23, %c36] : memref<8x64xbf16, #tpu.memory_space<vmem>>, vector<8x4xbf16>
    %cst_24 = arith.constant dense<0.000000e+00> : vector<8x8xf32>
    %48 = tpu.matmul %45, %46, %cst_24 {dimension_numbers = #tpu.dot_dimension_numbers<[1], [1], [0], [0], [0, 0, 1, 0], [], []>} : vector<8x4xbf16>, vector<8x4xbf16>, vector<8x8xf32> -> vector<8x8xf32>
    %cst_25 = arith.constant -1.000000e+30 : f32
    %49 = vector.broadcast %cst_25 : f32 to vector<8x8xf32>
    %50 = arith.select %25, %49, %48 : vector<8x8xi1>, vector<8x8xf32>
    %cst_26 = arith.constant dense<0xFF800000> : vector<8xf32>
    %51 = vector.multi_reduction <maximumf>, %50, %cst_26 [1] : vector<8x8xf32> to vector<8xf32>
    %52 = vector.shape_cast %51 : vector<8xf32> to vector<8x1xf32>
    %53 = vector.broadcast %52 : vector<8x1xf32> to vector<8x8xf32>
    %54 = arith.subf %50, %53 : vector<8x8xf32>
    %55 = math.exp %54 : vector<8x8xf32>
    %cst_27 = arith.constant dense<0.000000e+00> : vector<8xf32>
    %56 = vector.multi_reduction <add>, %55, %cst_27 [1] : vector<8x8xf32> to vector<8xf32>
    %57 = vector.shape_cast %56 : vector<8xf32> to vector<8x1xf32>
    %58 = tpu.reciprocal %57 {approx = true} : vector<8x1xf32> -> vector<8x1xf32>
    %59 = vector.broadcast %58 : vector<8x1xf32> to vector<8x8xf32>
    %60 = arith.mulf %55, %59 : vector<8x8xf32>
    %61 = arith.truncf %60 : vector<8x8xf32> to vector<8x8xbf16>
    %cst_28 = arith.constant dense<0.000000e+00> : vector<8x4xf32>
    %62 = tpu.matmul %61, %47, %cst_28 {dimension_numbers = #tpu.dot_dimension_numbers<[1], [0], [0], [1], [0, 0, 1, 1], [], []>} : vector<8x8xbf16>, vector<8x4xbf16>, vector<8x4xf32> -> vector<8x4xf32>
    %c0_29 = arith.constant 0 : index
    %c4_30 = arith.constant 4 : index
    %63 = vector.load %arg15[%c0_29, %c4_30] : memref<8x32xf32, #tpu.memory_space<vmem>>, vector<8x4xf32>
    tpu.vector_store %arg15[%c0_29, %c4_30], %62 {strides = array<i32>} : memref<8x32xf32, #tpu.memory_space<vmem>>, vector<8x4xf32>,
    %64 = vector.extract_strided_slice %13 {offsets = [0, 8], sizes = [8, 4], strides = [1, 1]} : vector<8x32xbf16> to vector<8x4xbf16>
    %c0_31 = arith.constant 0 : index
    %c8 = arith.constant 8 : index
    %65 = vector.load %arg14[%c0_31, %c8] : memref<8x64xbf16, #tpu.memory_space<vmem>>, vector<8x4xbf16>
    %c0_32 = arith.constant 0 : index
    %c40 = arith.constant 40 : index
    %66 = vector.load %arg14[%c0_32, %c40] : memref<8x64xbf16, #tpu.memory_space<vmem>>, vector<8x4xbf16>
    %cst_33 = arith.constant dense<0.000000e+00> : vector<8x8xf32>
    %67 = tpu.matmul %64, %65, %cst_33 {dimension_numbers = #tpu.dot_dimension_numbers<[1], [1], [0], [0], [0, 0, 1, 0], [], []>} : vector<8x4xbf16>, vector<8x4xbf16>, vector<8x8xf32> -> vector<8x8xf32>
    %cst_34 = arith.constant -1.000000e+30 : f32
    %68 = vector.broadcast %cst_34 : f32 to vector<8x8xf32>
    %69 = arith.select %25, %68, %67 : vector<8x8xi1>, vector<8x8xf32>
    %cst_35 = arith.constant dense<0xFF800000> : vector<8xf32>
    %70 = vector.multi_reduction <maximumf>, %69, %cst_35 [1] : vector<8x8xf32> to vector<8xf32>
    %71 = vector.shape_cast %70 : vector<8xf32> to vector<8x1xf32>
    %72 = vector.broadcast %71 : vector<8x1xf32> to vector<8x8xf32>
    %73 = arith.subf %69, %72 : vector<8x8xf32>
    %74 = math.exp %73 : vector<8x8xf32>
    %cst_36 = arith.constant dense<0.000000e+00> : vector<8xf32>
    %75 = vector.multi_reduction <add>, %74, %cst_36 [1] : vector<8x8xf32> to vector<8xf32>
    %76 = vector.shape_cast %75 : vector<8xf32> to vector<8x1xf32>
    %77 = tpu.reciprocal %76 {approx = true} : vector<8x1xf32> -> vector<8x1xf32>
    %78 = vector.broadcast %77 : vector<8x1xf32> to vector<8x8xf32>
    %79 = arith.mulf %74, %78 : vector<8x8xf32>
    %80 = arith.truncf %79 : vector<8x8xf32> to vector<8x8xbf16>
    %cst_37 = arith.constant dense<0.000000e+00> : vector<8x4xf32>
    %81 = tpu.matmul %80, %66, %cst_37 {dimension_numbers = #tpu.dot_dimension_numbers<[1], [0], [0], [1], [0, 0, 1, 1], [], []>} : vector<8x8xbf16>, vector<8x4xbf16>, vector<8x4xf32> -> vector<8x4xf32>
    %c0_38 = arith.constant 0 : index
    %c8_39 = arith.constant 8 : index
    %82 = vector.load %arg15[%c0_38, %c8_39] : memref<8x32xf32, #tpu.memory_space<vmem>>, vector<8x4xf32>
    tpu.vector_store %arg15[%c0_38, %c8_39], %81 {strides = array<i32>} : memref<8x32xf32, #tpu.memory_space<vmem>>, vector<8x4xf32>,
    %83 = vector.extract_strided_slice %13 {offsets = [0, 12], sizes = [8, 4], strides = [1, 1]} : vector<8x32xbf16> to vector<8x4xbf16>
    %c0_40 = arith.constant 0 : index
    %c12 = arith.constant 12 : index
    %84 = vector.load %arg14[%c0_40, %c12] : memref<8x64xbf16, #tpu.memory_space<vmem>>, vector<8x4xbf16>
    %c0_41 = arith.constant 0 : index
    %c44 = arith.constant 44 : index
    %85 = vector.load %arg14[%c0_41, %c44] : memref<8x64xbf16, #tpu.memory_space<vmem>>, vector<8x4xbf16>
    %cst_42 = arith.constant dense<0.000000e+00> : vector<8x8xf32>
    %86 = tpu.matmul %83, %84, %cst_42 {dimension_numbers = #tpu.dot_dimension_numbers<[1], [1], [0], [0], [0, 0, 1, 0], [], []>} : vector<8x4xbf16>, vector<8x4xbf16>, vector<8x8xf32> -> vector<8x8xf32>
    %cst_43 = arith.constant -1.000000e+30 : f32
    %87 = vector.broadcast %cst_43 : f32 to vector<8x8xf32>
    %88 = arith.select %25, %87, %86 : vector<8x8xi1>, vector<8x8xf32>
    %cst_44 = arith.constant dense<0xFF800000> : vector<8xf32>
    %89 = vector.multi_reduction <maximumf>, %88, %cst_44 [1] : vector<8x8xf32> to vector<8xf32>
    %90 = vector.shape_cast %89 : vector<8xf32> to vector<8x1xf32>
    %91 = vector.broadcast %90 : vector<8x1xf32> to vector<8x8xf32>
    %92 = arith.subf %88, %91 : vector<8x8xf32>
    %93 = math.exp %92 : vector<8x8xf32>
    %cst_45 = arith.constant dense<0.000000e+00> : vector<8xf32>
    %94 = vector.multi_reduction <add>, %93, %cst_45 [1] : vector<8x8xf32> to vector<8xf32>
    %95 = vector.shape_cast %94 : vector<8xf32> to vector<8x1xf32>
    %96 = tpu.reciprocal %95 {approx = true} : vector<8x1xf32> -> vector<8x1xf32>
    %97 = vector.broadcast %96 : vector<8x1xf32> to vector<8x8xf32>
    %98 = arith.mulf %93, %97 : vector<8x8xf32>
    %99 = arith.truncf %98 : vector<8x8xf32> to vector<8x8xbf16>
    %cst_46 = arith.constant dense<0.000000e+00> : vector<8x4xf32>
    %100 = tpu.matmul %99, %85, %cst_46 {dimension_numbers = #tpu.dot_dimension_numbers<[1], [0], [0], [1], [0, 0, 1, 1], [], []>} : vector<8x8xbf16>, vector<8x4xbf16>, vector<8x4xf32> -> vector<8x4xf32>
    %c0_47 = arith.constant 0 : index
    %c12_48 = arith.constant 12 : index
    %101 = vector.load %arg15[%c0_47, %c12_48] : memref<8x32xf32, #tpu.memory_space<vmem>>, vector<8x4xf32>
    tpu.vector_store %arg15[%c0_47, %c12_48], %100 {strides = array<i32>} : memref<8x32xf32, #tpu.memory_space<vmem>>, vector<8x4xf32>,
    %102 = vector.extract_strided_slice %13 {offsets = [0, 16], sizes = [8, 4], strides = [1, 1]} : vector<8x32xbf16> to vector<8x4xbf16>
    %c0_49 = arith.constant 0 : index
    %c16 = arith.constant 16 : index
    %103 = vector.load %arg14[%c0_49, %c16] : memref<8x64xbf16, #tpu.memory_space<vmem>>, vector<8x4xbf16>
    %c0_50 = arith.constant 0 : index
    %c48 = arith.constant 48 : index
    %104 = vector.load %arg14[%c0_50, %c48] : memref<8x64xbf16, #tpu.memory_space<vmem>>, vector<8x4xbf16>
    %cst_51 = arith.constant dense<0.000000e+00> : vector<8x8xf32>
    %105 = tpu.matmul %102, %103, %cst_51 {dimension_numbers = #tpu.dot_dimension_numbers<[1], [1], [0], [0], [0, 0, 1, 0], [], []>} : vector<8x4xbf16>, vector<8x4xbf16>, vector<8x8xf32> -> vector<8x8xf32>
    %cst_52 = arith.constant -1.000000e+30 : f32
    %106 = vector.broadcast %cst_52 : f32 to vector<8x8xf32>
    %107 = arith.select %25, %106, %105 : vector<8x8xi1>, vector<8x8xf32>
    %cst_53 = arith.constant dense<0xFF800000> : vector<8xf32>
    %108 = vector.multi_reduction <maximumf>, %107, %cst_53 [1] : vector<8x8xf32> to vector<8xf32>
    %109 = vector.shape_cast %108 : vector<8xf32> to vector<8x1xf32>
    %110 = vector.broadcast %109 : vector<8x1xf32> to vector<8x8xf32>
    %111 = arith.subf %107, %110 : vector<8x8xf32>
    %112 = math.exp %111 : vector<8x8xf32>
    %cst_54 = arith.constant dense<0.000000e+00> : vector<8xf32>
    %113 = vector.multi_reduction <add>, %112, %cst_54 [1] : vector<8x8xf32> to vector<8xf32>
    %114 = vector.shape_cast %113 : vector<8xf32> to vector<8x1xf32>
    %115 = tpu.reciprocal %114 {approx = true} : vector<8x1xf32> -> vector<8x1xf32>
    %116 = vector.broadcast %115 : vector<8x1xf32> to vector<8x8xf32>
    %117 = arith.mulf %112, %116 : vector<8x8xf32>
    %118 = arith.truncf %117 : vector<8x8xf32> to vector<8x8xbf16>
    %cst_55 = arith.constant dense<0.000000e+00> : vector<8x4xf32>
    %119 = tpu.matmul %118, %104, %cst_55 {dimension_numbers = #tpu.dot_dimension_numbers<[1], [0], [0], [1], [0, 0, 1, 1], [], []>} : vector<8x8xbf16>, vector<8x4xbf16>, vector<8x4xf32> -> vector<8x4xf32>
    %c0_56 = arith.constant 0 : index
    %c16_57 = arith.constant 16 : index
    %120 = vector.load %arg15[%c0_56, %c16_57] : memref<8x32xf32, #tpu.memory_space<vmem>>, vector<8x4xf32>
    tpu.vector_store %arg15[%c0_56, %c16_57], %119 {strides = array<i32>} : memref<8x32xf32, #tpu.memory_space<vmem>>, vector<8x4xf32>,
    %121 = vector.extract_strided_slice %13 {offsets = [0, 20], sizes = [8, 4], strides = [1, 1]} : vector<8x32xbf16> to vector<8x4xbf16>
    %c0_58 = arith.constant 0 : index
    %c20 = arith.constant 20 : index
    %122 = vector.load %arg14[%c0_58, %c20] : memref<8x64xbf16, #tpu.memory_space<vmem>>, vector<8x4xbf16>
    %c0_59 = arith.constant 0 : index
    %c52 = arith.constant 52 : index
    %123 = vector.load %arg14[%c0_59, %c52] : memref<8x64xbf16, #tpu.memory_space<vmem>>, vector<8x4xbf16>
    %cst_60 = arith.constant dense<0.000000e+00> : vector<8x8xf32>
    %124 = tpu.matmul %121, %122, %cst_60 {dimension_numbers = #tpu.dot_dimension_numbers<[1], [1], [0], [0], [0, 0, 1, 0], [], []>} : vector<8x4xbf16>, vector<8x4xbf16>, vector<8x8xf32> -> vector<8x8xf32>
    %cst_61 = arith.constant -1.000000e+30 : f32
    %125 = vector.broadcast %cst_61 : f32 to vector<8x8xf32>
    %126 = arith.select %25, %125, %124 : vector<8x8xi1>, vector<8x8xf32>
    %cst_62 = arith.constant dense<0xFF800000> : vector<8xf32>
    %127 = vector.multi_reduction <maximumf>, %126, %cst_62 [1] : vector<8x8xf32> to vector<8xf32>
    %128 = vector.shape_cast %127 : vector<8xf32> to vector<8x1xf32>
    %129 = vector.broadcast %128 : vector<8x1xf32> to vector<8x8xf32>
    %130 = arith.subf %126, %129 : vector<8x8xf32>
    %131 = math.exp %130 : vector<8x8xf32>
    %cst_63 = arith.constant dense<0.000000e+00> : vector<8xf32>
    %132 = vector.multi_reduction <add>, %131, %cst_63 [1] : vector<8x8xf32> to vector<8xf32>
    %133 = vector.shape_cast %132 : vector<8xf32> to vector<8x1xf32>
    %134 = tpu.reciprocal %133 {approx = true} : vector<8x1xf32> -> vector<8x1xf32>
    %135 = vector.broadcast %134 : vector<8x1xf32> to vector<8x8xf32>
    %136 = arith.mulf %131, %135 : vector<8x8xf32>
    %137 = arith.truncf %136 : vector<8x8xf32> to vector<8x8xbf16>
    %cst_64 = arith.constant dense<0.000000e+00> : vector<8x4xf32>
    %138 = tpu.matmul %137, %123, %cst_64 {dimension_numbers = #tpu.dot_dimension_numbers<[1], [0], [0], [1], [0, 0, 1, 1], [], []>} : vector<8x8xbf16>, vector<8x4xbf16>, vector<8x4xf32> -> vector<8x4xf32>
    %c0_65 = arith.constant 0 : index
    %c20_66 = arith.constant 20 : index
    %139 = vector.load %arg15[%c0_65, %c20_66] : memref<8x32xf32, #tpu.memory_space<vmem>>, vector<8x4xf32>
    tpu.vector_store %arg15[%c0_65, %c20_66], %138 {strides = array<i32>} : memref<8x32xf32, #tpu.memory_space<vmem>>, vector<8x4xf32>,
    %140 = vector.extract_strided_slice %13 {offsets = [0, 24], sizes = [8, 4], strides = [1, 1]} : vector<8x32xbf16> to vector<8x4xbf16>
    %c0_67 = arith.constant 0 : index
    %c24 = arith.constant 24 : index
    %141 = vector.load %arg14[%c0_67, %c24] : memref<8x64xbf16, #tpu.memory_space<vmem>>, vector<8x4xbf16>
    %c0_68 = arith.constant 0 : index
    %c56 = arith.constant 56 : index
    %142 = vector.load %arg14[%c0_68, %c56] : memref<8x64xbf16, #tpu.memory_space<vmem>>, vector<8x4xbf16>
    %cst_69 = arith.constant dense<0.000000e+00> : vector<8x8xf32>
    %143 = tpu.matmul %140, %141, %cst_69 {dimension_numbers = #tpu.dot_dimension_numbers<[1], [1], [0], [0], [0, 0, 1, 0], [], []>} : vector<8x4xbf16>, vector<8x4xbf16>, vector<8x8xf32> -> vector<8x8xf32>
    %cst_70 = arith.constant -1.000000e+30 : f32
    %144 = vector.broadcast %cst_70 : f32 to vector<8x8xf32>
    %145 = arith.select %25, %144, %143 : vector<8x8xi1>, vector<8x8xf32>
    %cst_71 = arith.constant dense<0xFF800000> : vector<8xf32>
    %146 = vector.multi_reduction <maximumf>, %145, %cst_71 [1] : vector<8x8xf32> to vector<8xf32>
    %147 = vector.shape_cast %146 : vector<8xf32> to vector<8x1xf32>
    %148 = vector.broadcast %147 : vector<8x1xf32> to vector<8x8xf32>
    %149 = arith.subf %145, %148 : vector<8x8xf32>
    %150 = math.exp %149 : vector<8x8xf32>
    %cst_72 = arith.constant dense<0.000000e+00> : vector<8xf32>
    %151 = vector.multi_reduction <add>, %150, %cst_72 [1] : vector<8x8xf32> to vector<8xf32>
    %152 = vector.shape_cast %151 : vector<8xf32> to vector<8x1xf32>
    %153 = tpu.reciprocal %152 {approx = true} : vector<8x1xf32> -> vector<8x1xf32>
    %154 = vector.broadcast %153 : vector<8x1xf32> to vector<8x8xf32>
    %155 = arith.mulf %150, %154 : vector<8x8xf32>
    %156 = arith.truncf %155 : vector<8x8xf32> to vector<8x8xbf16>
    %cst_73 = arith.constant dense<0.000000e+00> : vector<8x4xf32>
    %157 = tpu.matmul %156, %142, %cst_73 {dimension_numbers = #tpu.dot_dimension_numbers<[1], [0], [0], [1], [0, 0, 1, 1], [], []>} : vector<8x8xbf16>, vector<8x4xbf16>, vector<8x4xf32> -> vector<8x4xf32>
    %c0_74 = arith.constant 0 : index
    %c24_75 = arith.constant 24 : index
    %158 = vector.load %arg15[%c0_74, %c24_75] : memref<8x32xf32, #tpu.memory_space<vmem>>, vector<8x4xf32>
    tpu.vector_store %arg15[%c0_74, %c24_75], %157 {strides = array<i32>} : memref<8x32xf32, #tpu.memory_space<vmem>>, vector<8x4xf32>,
    %159 = vector.extract_strided_slice %13 {offsets = [0, 28], sizes = [8, 4], strides = [1, 1]} : vector<8x32xbf16> to vector<8x4xbf16>
    %c0_76 = arith.constant 0 : index
    %c28 = arith.constant 28 : index
    %160 = vector.load %arg14[%c0_76, %c28] : memref<8x64xbf16, #tpu.memory_space<vmem>>, vector<8x4xbf16>
    %c0_77 = arith.constant 0 : index
    %c60 = arith.constant 60 : index
    %161 = vector.load %arg14[%c0_77, %c60] : memref<8x64xbf16, #tpu.memory_space<vmem>>, vector<8x4xbf16>
    %cst_78 = arith.constant dense<0.000000e+00> : vector<8x8xf32>
    %162 = tpu.matmul %159, %160, %cst_78 {dimension_numbers = #tpu.dot_dimension_numbers<[1], [1], [0], [0], [0, 0, 1, 0], [], []>} : vector<8x4xbf16>, vector<8x4xbf16>, vector<8x8xf32> -> vector<8x8xf32>
    %cst_79 = arith.constant -1.000000e+30 : f32
    %163 = vector.broadcast %cst_79 : f32 to vector<8x8xf32>
    %164 = arith.select %25, %163, %162 : vector<8x8xi1>, vector<8x8xf32>
    %cst_80 = arith.constant dense<0xFF800000> : vector<8xf32>
    %165 = vector.multi_reduction <maximumf>, %164, %cst_80 [1] : vector<8x8xf32> to vector<8xf32>
    %166 = vector.shape_cast %165 : vector<8xf32> to vector<8x1xf32>
    %167 = vector.broadcast %166 : vector<8x1xf32> to vector<8x8xf32>
    %168 = arith.subf %164, %167 : vector<8x8xf32>
    %169 = math.exp %168 : vector<8x8xf32>
    %cst_81 = arith.constant dense<0.000000e+00> : vector<8xf32>
    %170 = vector.multi_reduction <add>, %169, %cst_81 [1] : vector<8x8xf32> to vector<8xf32>
    %171 = vector.shape_cast %170 : vector<8xf32> to vector<8x1xf32>
    %172 = tpu.reciprocal %171 {approx = true} : vector<8x1xf32> -> vector<8x1xf32>
    %173 = vector.broadcast %172 : vector<8x1xf32> to vector<8x8xf32>
    %174 = arith.mulf %169, %173 : vector<8x8xf32>
    %175 = arith.truncf %174 : vector<8x8xf32> to vector<8x8xbf16>
    %cst_82 = arith.constant dense<0.000000e+00> : vector<8x4xf32>
    %176 = tpu.matmul %175, %161, %cst_82 {dimension_numbers = #tpu.dot_dimension_numbers<[1], [0], [0], [1], [0, 0, 1, 1], [], []>} : vector<8x8xbf16>, vector<8x4xbf16>, vector<8x4xf32> -> vector<8x4xf32>
    %c0_83 = arith.constant 0 : index
    %c28_84 = arith.constant 28 : index
    %177 = vector.load %arg15[%c0_83, %c28_84] : memref<8x32xf32, #tpu.memory_space<vmem>>, vector<8x4xf32>
    tpu.vector_store %arg15[%c0_83, %c28_84], %176 {strides = array<i32>} : memref<8x32xf32, #tpu.memory_space<vmem>>, vector<8x4xf32>,
    %c0_85 = arith.constant 0 : index
    %c0_86 = arith.constant 0 : index
    %178 = vector.load %arg15[%c0_85, %c0_86] : memref<8x32xf32, #tpu.memory_space<vmem>>, vector<8x32xf32>
    %179 = arith.truncf %178 : vector<8x32xf32> to vector<8x32xbf16>
    %c0_87 = arith.constant 0 : index
    %c0_88 = arith.constant 0 : index
    %180 = vector.load %arg9[%c0_87, %c0_88] : memref<32x32xbf16, #tpu.memory_space<vmem>>, vector<32x32xbf16>
    %cst_89 = arith.constant dense<0.000000e+00> : vector<8x32xf32>
    %181 = tpu.matmul %179, %180, %cst_89 {dimension_numbers = #tpu.dot_dimension_numbers<[1], [0], [0], [1], [0, 0, 1, 1], [], []>} : vector<8x32xbf16>, vector<32x32xbf16>, vector<8x32xf32> -> vector<8x32xf32>
    %c0_90 = arith.constant 0 : index
    %c0_91 = arith.constant 0 : index
    %182 = vector.load %arg10[%c0_90, %c0_91] : memref<1x32xf32, #tpu.memory_space<vmem>>, vector<1x32xf32>
    %183 = vector.broadcast %182 : vector<1x32xf32> to vector<8x32xf32>
    %184 = arith.addf %181, %183 : vector<8x32xf32>
    %185 = arith.addf %4, %184 : vector<8x32xf32>
    %cst_92 = arith.constant dense<0.000000e+00> : vector<8xf32>
    %186 = vector.multi_reduction <add>, %185, %cst_92 [1] : vector<8x32xf32> to vector<8xf32>
    %187 = vector.shape_cast %186 : vector<8xf32> to vector<8x1xf32>
    %cst_93 = arith.constant 3.200000e+01 : f32
    %188 = vector.broadcast %cst_93 : f32 to vector<8x1xf32>
    %189 = arith.divf %187, %188 : vector<8x1xf32>
    %190 = vector.broadcast %189 : vector<8x1xf32> to vector<8x32xf32>
    %191 = arith.subf %185, %190 : vector<8x32xf32>
    %192 = arith.mulf %191, %191 : vector<8x32xf32>
    %cst_94 = arith.constant dense<0.000000e+00> : vector<8xf32>
    %193 = vector.multi_reduction <add>, %192, %cst_94 [1] : vector<8x32xf32> to vector<8xf32>
    %194 = vector.shape_cast %193 : vector<8xf32> to vector<8x1xf32>
    %cst_95 = arith.constant 3.100000e+01 : f32
    %195 = vector.broadcast %cst_95 : f32 to vector<8x1xf32>
    %196 = arith.divf %194, %195 : vector<8x1xf32>
    %c0_96 = arith.constant 0 : index
    %c0_97 = arith.constant 0 : index
    %197 = vector.load %arg11[%c0_96, %c0_97] : memref<1x32xf32, #tpu.memory_space<vmem>>, vector<1x32xf32>
    %198 = vector.broadcast %197 : vector<1x32xf32> to vector<8x32xf32>
    %199 = arith.mulf %198, %191 : vector<8x32xf32>
    %200 = math.sqrt %196 : vector<8x1xf32>
    %cst_98 = arith.constant 9.99999997E-7 : f32
    %201 = vector.broadcast %cst_98 : f32 to vector<8x1xf32>
    %202 = arith.addf %200, %201 : vector<8x1xf32>
    %203 = vector.broadcast %202 : vector<8x1xf32> to vector<8x32xf32>
    %204 = arith.divf %199, %203 : vector<8x32xf32>
    %c0_99 = arith.constant 0 : index
    %c0_100 = arith.constant 0 : index
    %205 = vector.load %arg12[%c0_99, %c0_100] : memref<1x32xf32, #tpu.memory_space<vmem>>, vector<1x32xf32>
    %206 = vector.broadcast %205 : vector<1x32xf32> to vector<8x32xf32>
    %207 = arith.addf %204, %206 : vector<8x32xf32>
    %c0_101 = arith.constant 0 : index
    %c0_102 = arith.constant 0 : index
    %c0_103 = arith.constant 0 : index
    %208 = vector.load %arg13[%c0_101, %c0_102, %c0_103] : memref<1x8x32xf32, #tpu.memory_space<vmem>>, vector<1x8x32xf32>
    %209 = vector.shape_cast %208 : vector<1x8x32xf32> to vector<8x32xf32>
    %210 = vector.shape_cast %207 : vector<8x32xf32> to vector<1x8x32xf32>
    tpu.vector_store %arg13[%c0_101, %c0_102, %c0_103], %210 {strides = array<i32>} : memref<1x8x32xf32, #tpu.memory_space<vmem>>, vector<1x8x32xf32>,
    return
  }
  func.func @transform_0(%arg0: i32, %arg1: i32) -> (i32, i32, i32) {
    %c0_i32 = arith.constant 0 : i32
    %c0_i32_0 = arith.constant 0 : i32
    return %arg0, %arg1, %c0_i32 : i32, i32, i32
  }
  func.func @transform_1(%arg0: i32, %arg1: i32) -> (i32, i32, i32) {
    %c0_i32 = arith.constant 0 : i32
    %c0_i32_0 = arith.constant 0 : i32
    %c0_i32_1 = arith.constant 0 : i32
    return %arg0, %c0_i32, %c0_i32_0 : i32, i32, i32
  }
  func.func @transform_2(%arg0: i32, %arg1: i32) -> (i32, i32, i32) {
    %c0_i32 = arith.constant 0 : i32
    %c0_i32_0 = arith.constant 0 : i32
    %c0_i32_1 = arith.constant 0 : i32
    return %arg0, %c0_i32, %c0_i32_0 : i32, i32, i32
  }
  func.func @transform_3(%arg0: i32, %arg1: i32) -> (i32, i32) {
    %c0_i32 = arith.constant 0 : i32
    %c0_i32_0 = arith.constant 0 : i32
    %c0_i32_1 = arith.constant 0 : i32
    return %c0_i32, %c0_i32_0 : i32, i32
  }
  func.func @transform_4(%arg0: i32, %arg1: i32) -> (i32, i32) {
    %c0_i32 = arith.constant 0 : i32
    %c0_i32_0 = arith.constant 0 : i32
    %c0_i32_1 = arith.constant 0 : i32
    return %c0_i32, %c0_i32_0 : i32, i32
  }
  func.func @transform_5(%arg0: i32, %arg1: i32) -> (i32, i32) {
    %c0_i32 = arith.constant 0 : i32
    %c0_i32_0 = arith.constant 0 : i32
    %c0_i32_1 = arith.constant 0 : i32
    return %c0_i32, %c0_i32_0 : i32, i32
  }
  func.func @transform_6(%arg0: i32, %arg1: i32) -> (i32, i32) {
    %c0_i32 = arith.constant 0 : i32
    %c0_i32_0 = arith.constant 0 : i32
    %c0_i32_1 = arith.constant 0 : i32
    return %c0_i32, %c0_i32_0 : i32, i32
  }
  func.func @transform_7(%arg0: i32, %arg1: i32) -> (i32, i32) {
    %c0_i32 = arith.constant 0 : i32
    %c0_i32_0 = arith.constant 0 : i32
    %c0_i32_1 = arith.constant 0 : i32
    return %c0_i32, %c0_i32_0 : i32, i32
  }
  func.func @transform_8(%arg0: i32, %arg1: i32) -> (i32, i32) {
    %c0_i32 = arith.constant 0 : i32
    %c0_i32_0 = arith.constant 0 : i32
    %c0_i32_1 = arith.constant 0 : i32
    return %c0_i32, %c0_i32_0 : i32, i32
  }
  func.func @transform_9(%arg0: i32, %arg1: i32) -> (i32, i32) {
    %c0_i32 = arith.constant 0 : i32
    %c0_i32_0 = arith.constant 0 : i32
    %c0_i32_1 = arith.constant 0 : i32
    return %c0_i32, %c0_i32_0 : i32, i32
  }
  func.func @transform_10(%arg0: i32, %arg1: i32) -> (i32, i32) {
    %c0_i32 = arith.constant 0 : i32
    %c0_i32_0 = arith.constant 0 : i32
    %c0_i32_1 = arith.constant 0 : i32
    return %c0_i32, %c0_i32_0 : i32, i32
  }
  func.func @transform_11(%arg0: i32, %arg1: i32) -> (i32, i32, i32) {
    %c0_i32 = arith.constant 0 : i32
    %c0_i32_0 = arith.constant 0 : i32
    return %arg0, %arg1, %c0_i32 : i32, i32, i32
  }
}

</mosaic_0001>

<bundles_post_ra>
// kernel: self_attention_block_forward.1
= control target key start
LH: loop header
LB: loop body
LE: loop exit
PB: predicated region body
PF: predicated region fallthrough
CT: control target
= control target key end

     0   :  { %s2192_s17 = smov 0   ;;  %s2194_s18 = smov 0   ;;  %s2490_s0 = inlined_call_operand.vmem [shape: f32[2,8,32], index: 0, kind: input, shape index: {}, may-alias: {0,1}]   ;;  %s2491_s1 = inlined_call_operand.vmem [shape: f32[2,8,32], index: 1, kind: input, shape index: {}, may-alias: {0,1}]   ;;  %s2492_s2 = inlined_call_operand.vmem [shape: f32[2,1,8], index: 2, kind: input, shape index: {}]   ;;  %s2493_s3 = inlined_call_operand.vmem [shape: bf16[32,32], index: 3, kind: input, shape index: {}]   ;;  %s2494_s4 = inlined_call_operand.vmem [shape: f32[1,32], index: 4, kind: input, shape index: {}]   ;;  %s2495_s5 = inlined_call_operand.vmem [shape: bf16[32,64], index: 5, kind: input, shape index: {}]   ;;  %s2496_s6 = inlined_call_operand.vmem [shape: f32[1,64], index: 6, kind: input, shape index: {}]   ;;  %s2497_s7 = inlined_call_operand.vmem [shape: bf16[32,32], index: 7, kind: input, shape index: {}]   ;;  %s2498_s8 = inlined_call_operand.vmem [shape: f32[1,32], index: 8, kind: input, shape index: {}]   ;;  %s2499_s9 = inlined_call_operand.vmem [shape: f32[1,32], index: 9, kind: input, shape index: {}]   ;;  %s2500_s10 = inlined_call_operand.vmem [shape: f32[1,32], index: 10, kind: input, shape index: {}]   ;;  %s2501_s11 = inlined_call_operand.vmem [shape: f32[2,8,32], index: 11, kind: output, shape index: {}]  }
   0x1   :  { %s2196_s19 = smov 0  }
   0x2 LB: > { %s33_s20 = sadd.s32 1, %s2101_s18  ;;  %p1779_p0 = scmp.ge.s32.totalorder %s2105_s19, 1  ;;  %s2105_s19 = sphi %s2196_s19, %s21_s19   ;;  %s2101_s18 = sphi %s2194_s18, %s2505_s18   ;;  %s2097_s17 = sphi %s2192_s17, %s2504_s17  }
   0x3   : > { %p35_p1 = scmp.ge.s32.totalorder %s33_s20, 2  ;;  %p372_p2 = scmp.lt.s32.totalorder %s2105_s19, 3 }
   0x5   : > { %s2507_s20 = smov (%p35_p1, %s33_s20), 0  ;;  %p373_p3 = pnand %p1779_p0, %p372_p2 }
   0x6   : > { %v2033_v0 = vld [vmem:[%s2495_s5] sm:$0xff] (!%p373_p3)   ;;  %v2107_v1 = vmov (!%p373_p3), 0.0   ;;  %v2034_v2 = vld [vmem:[%s2495_s5 + $0x8] sm:$0xff] (!%p373_p3)   ;;  %vm2108_vm0 = vmmov (!%p373_p3), 0   ;;  %p423_p4 = scmp.lt.s32.totalorder (!%p373_p3), %s2097_s17, 1  ;;  %vm474_vm1 = vcmask (!%p373_p3), 261120   ;;  %v593_v54 = vlaneseq (!%p373_p3) }
   0x7   : > { %376 = sbr.rel (%p373_p3) target bundleno = 1880 (0x758), region = 64  ;;  %1864 = vmatprep.subr.bf16.mxu0 (!%p373_p3), %v2107_v1  ;;  %1872 = vmatprep.subr.bf16.mxu1 (!%p373_p3), %v2107_v1  ;;  %v2035_v3 = vld [vmem:[%s2493_s3] sm:$0xff] (!%p373_p3)   ;;  %v2036_v4 = vld [vmem:[%s2493_s3 + $0x8] sm:$0xff] (!%p373_p3)   ;;  %vm519_vm2 = vcmask (!%p373_p3), 519168   ;;  %vm610_vm3 = vcmask (!%p373_p3), 31744   ;;  %s2109_s25 = smov (!%p373_p3), 120  }
   0x8   : > { %1865 = vmatpush3.bf16.msra.mxu0 (!%p373_p3), %v2033_v0  ;;  %1868 = vmatprep.mubr.msk.bf16.mxu0 (!%p373_p3), %vm2108_vm0, %v2107_v1  ;;  %v1783_v9 = vld [vmem:[%s2496_s6] ss:$0 sm:$0xff] (!%p373_p3)  ;;  %s2110_s26 = smov (!%p373_p3), 124   ;;  %s2111_s27 = smov (!%p373_p3), 116   ;;  %v594_v56 = vshrl.u32 (!%p373_p3), %v593_v54, 7  ;;  %v2116_v58 = vmov (!%p373_p3), 0  }
   0x9   : > { %1866 = vmatprep.subr.bf16.mxu0 (!%p373_p3), %v2107_v1  ;;  %1876 = vmatprep.mubr.msk.bf16.mxu1 (!%p373_p3), %vm2108_vm0, %v2107_v1  ;;  %v1787_v18 = vld [vmem:[%s2494_s4] ss:$0 sm:$0xff] (!%p373_p3)  ;;  %s2112_s28 = smov (!%p373_p3), 112   ;;  %s2113_s30 = smov (!%p373_p3), 108   ;;  %v598_v61 = vand.u32 (!%p373_p3), 127, %v593_v54  ;;  %vm658_vm8 = vcmask (!%p373_p3), 64512  }
   0xa   : > { %1873 = vmatpush3.bf16.msra.mxu1 (!%p373_p3), %v2035_v3  ;;  %s2114_s12 = smov (!%p373_p3), 104   ;;  %v605_v57 = vsub.s32 (!%p373_p3), 0, %v594_v56  ;;  %s2118_s21 = smov (!%p373_p3), 96   ;;  %vm679_vm9 = vcmask (!%p373_p3), 1043456   ;;  %vm844_vm10 = vcmask (!%p373_p3), 64544   ;;  %vm965_vm11 = vcmask (!%p373_p3), 97344  }
   0xb   : > { %1874 = vmatprep.subr.bf16.mxu1 (!%p373_p3), %v2107_v1  ;;  %vm599_vm6 = vcmp.gt.s32.totalorder (!%p373_p3), %v598_v61, %v594_v56  ;;  %s2119_s22 = smov (!%p373_p3), 88   ;;  %s2120_s23 = smov (!%p373_p3), 84   ;;  %vm1086_vm12 = vcmask (!%p373_p3), 130144   ;;  %vm1207_vm13 = vcmask (!%p373_p3), 162944   ;;  %vm1328_vm14 = vcmask (!%p373_p3), 195744  }
   0xc   : > { %1867 = vmatpush3.bf16.msra.mxu0 (!%p373_p3), %v2034_v2  ;;  %s2121_s24 = smov (!%p373_p3), 76   ;;  %s2129_s14 = smov (!%p373_p3), 20   ;;  %vm1449_vm15 = vcmask (!%p373_p3), 228544  }
   0xd   : > { %1880 = vmatprep.subr.bf16.mxu0 (!%p373_p3), %v2107_v1 }
   0xe   : > { %s2509_s17 = smov (!%p423_p4, %s2097_s17), 1  ;;  %1875 = vmatpush3.bf16.msra.mxu1 %v2036_v4 }
   0xf   : > { %s2232_s29 = sshll.u32 %s2509_s17, 3  ;;  %1886 = vmatprep.subr.bf16.mxu1 %v2107_v1 }
  0x10   : > { %s433_s13 = scalar_lea.vmem %s2491_s1, %s2232_s29  ;;  %s429_s16 = scalar_lea.vmem %s2490_s0, %s2232_s29 }
  0x11   : > { %v449_v5 = vld [vmem:[%s433_s13] sm:$0xff]  ;;  %s2115_s13 = smov 100  }
  0x12   : > { %v450_v6 = vpack.c.bf16 %v449_v5, %v449_v5  ;;  %v2244_v7 = vld [vmem:[%s429_s16] sm:$0xff]  ;;  %s436_s16 = scalar_lea.vmem %s2492_s2, %s2509_s17  ;;  %s2117_s17 = smov 92  }
  0x13   : > { %v522_v8 = vpack.c.bf16 %v2244_v7, %v2244_v7  ;;  %v600_v55 = vld [vmem:[%s436_s16] sm:$0x1] }
  0x14   : > { %1869 = vmatmul.mubr.msk.bf16.vlgmr.msra.gmra.mrb[0].mxu0 %vm474_vm1, %v450_v6  ;;  %vm601_vm4 = vcmp.gt.f32.partialorder %v600_v55, 0.5 }
  0x15   : > { %1877 = vmatmul.mubr.msk.bf16.vlgmr.msra.gmra.mrb[0].mxu1 %vm474_vm1, %v522_v8  ;;  %1882 = vmatprep.mubr.msk.bf16.mxu0 %vm2108_vm0, %v2107_v1  ;;  %v602_v59 = vsel %vm601_vm4, 1, %v2116_v58 }
  0x16   : > { %1888 = vmatprep.mubr.msk.bf16.mxu1 %vm2108_vm0, %v2107_v1  ;;  %v606_v60 = vrot.slane %v602_v59, %v605_v57 }
  0x18   : > { %vm607_vm5 = vcmp.eq.s32.totalorder %v606_v60, 1 }
  0x19   : > { %vm2329_vm7 = vmor %vm599_vm6, %vm607_vm5 }
  0xe7   : > { %v512_v10 = vpop.f32.mrb[0].mxu0 }
  0xe8   : > { %v513_v11 = vadd.f32 %v1783_v9, %v512_v10  ;;  %v1870_v12 = vpop.f32.mrb[1].mxu0  ;;  %v584_v13 = vpop.f32.mrb[0].mxu1 }
  0xe9   : > { %v515_v14 = vpop.f32.mrb[2].mxu0  ;;  %v1878_v15 = vpop.f32.mrb[1].mxu1  ;;  %v585_v21 = vadd.f32 %v1787_v18, %v584_v13 }
  0xea   : > { %v518_v16 = vpack.c.bf16 %v513_v11, %v513_v11  ;;  %v1871_v17 = vpop.f32.mrb[3].mxu0  ;;  %v587_v19 = vpop.f32.mrb[2].mxu1 }
  0xeb   : > { %v1879_v20 = vpop.f32.mrb[3].mxu1  ;;  %v590_v22 = vmul.f32 0.5, %v585_v21 }
  0xec   : > { %520 = vst.msk [vmem:[#allocation2] sm:$0xf] %vm519_vm2, %v518_v16 }
  0xed   : > { %v591_v27 = vpack.c.bf16 %v590_v22, %v590_v22 }
  0xf3   : > { %v2261_v23 = vld [vmem:[#allocation2] sm:$0xf] }
  0xf4   : > { %v2263_v24 = vld [vmem:[#allocation2] ss:$0 sps:$4 sm:$0xff]   ;;  %v615_v25 = vsel %vm610_vm3, %v2261_v23, 0  ;;  %v1792_v55 = vcombine.low %v2261_v23, %v2261_v23 }
  0xf5   : > { %v2267_v26 = vld [vmem:[#allocation2] ss:$0 sps:$4 sm:$0xff]   ;;  %1881 = vmatpush3.bf16.xpose.msra.mxu0 %v615_v25  ;;  %852 = vrot.lane.b32.xlu1 %v2263_v24, %s2109_s25 }
  0xf6   : > { %731 = vrot.lane.b32.xlu0 %v2267_v26, %s2110_s26  ;;  %1892 = vmatprep.subr.bf16.mxu0 %v2107_v1  ;;  %v2273_v28 = vld [vmem:[#allocation2] ss:$0 sps:$4 sm:$0xff]  }
  0xf7   : > { %v2278_v29 = vld [vmem:[#allocation2] ss:$0 sps:$4 sm:$0xff]  }
  0xf8   : > { %v2281_v30 = vld [vmem:[#allocation2] ss:$0 sps:$4 sm:$0xff]  }
  0xf9   : > { %847 = vrot.lane.b32.xlu1 %v591_v27, %s2109_s25  ;;  %v2284_v31 = vld [vmem:[#allocation2] ss:$0 sps:$4 sm:$0xff]   ;;  %s2122_s25 = smov 72  }
  0xfa   : > { %726 = vrot.lane.b32.xlu0 %v591_v27, %s2110_s26  ;;  %v2287_v32 = vld [vmem:[#allocation2] ss:$0 sps:$4 sm:$0xff]   ;;  %s2123_s26 = smov 68  }
  0xfc   : > { %1883 = vmatmul.mubr.msk.bf16.vlgmr.msra.gmra.mrb[4].mxu0 %vm610_vm3, %v591_v27 }
  0xfd   : > { %968 = vrot.lane.b32.xlu1 %v591_v27, %s2111_s27  ;;  %1894 = vmatprep.mubr.msk.bf16.mxu0 %vm2108_vm0, %v2107_v1 }
  0xfe   : > { %973 = vrot.lane.b32.xlu0 %v2273_v28, %s2111_s27  ;;  %s2124_s27 = smov 80  }
 0x101   : > { %1089 = vrot.lane.b32.xlu1 %v591_v27, %s2112_s28 }
 0x102   : > { %1094 = vrot.lane.b32.xlu0 %v2278_v29, %s2112_s28  ;;  %s2125_s28 = smov 4  }
 0x105   : > { %1210 = vrot.lane.b32.xlu1 %v591_v27, %s2113_s30 }
 0x106   : > { %1215 = vrot.lane.b32.xlu0 %v2281_v30, %s2113_s30  ;;  %s2126_s30 = smov 8  }
 0x109   : > { %1331 = vrot.lane.b32.xlu1 %v591_v27, %s2114_s12 }
 0x10a   : > { %1336 = vrot.lane.b32.xlu0 %v2284_v31, %s2114_s12  ;;  %s2127_s12 = smov 12  }
 0x10d   : > { %1452 = vrot.lane.b32.xlu1 %v591_v27, %s2115_s13 }
 0x10e   : > { %1457 = vrot.lane.b32.xlu0 %v2287_v32, %s2115_s13  ;;  %s2128_s13 = smov 16  }
 0x167   : > { %v853_v35 = vpop.permute.xlu1 %852 }
 0x168   : > { %v732_v33 = vpop.permute.xlu0 %731  ;;  %v858_v37 = vsel %vm610_vm3, %v853_v35, 0 }
 0x169   : > { %v737_v34 = vsel %vm610_vm3, %v732_v33, 0 }
 0x16a   : > { %1893 = vmatpush3.bf16.xpose.msra.mxu0 %v737_v34 }
 0x16b   : > { %1904 = vmatprep.subr.bf16.mxu0 %v2107_v1  ;;  %v848_v39 = vpop.permute.xlu1 %847 }
 0x16c   : > { %v727_v36 = vpop.permute.xlu0 %726 }
 0x16f   : > { %v969_v42 = vpop.permute.xlu1 %968 }
 0x170   : > { %v974_v38 = vpop.permute.xlu0 %973 }
 0x171   : > { %1895 = vmatmul.mubr.msk.bf16.vlgmr.msra.gmra.mrb[8].mxu0 %vm610_vm3, %v727_v36  ;;  %v979_v40 = vsel %vm610_vm3, %v974_v38, 0 }
 0x172   : > { %1905 = vmatpush3.bf16.xpose.msra.mxu0 %v858_v37  ;;  %1906 = vmatprep.mubr.msk.bf16.mxu0 %vm2108_vm0, %v2107_v1 }
 0x173   : > { %1916 = vmatprep.subr.bf16.mxu0 %v2107_v1  ;;  %v1090_v45 = vpop.permute.xlu1 %1089 }
 0x174   : > { %v1095_v41 = vpop.permute.xlu0 %1094 }
 0x175   : > { %v1100_v43 = vsel %vm610_vm3, %v1095_v41, 0 }
 0x177   : > { %v1211_v48 = vpop.permute.xlu1 %1210 }
 0x178   : > { %v1216_v44 = vpop.permute.xlu0 %1215 }
 0x179   : > { %1907 = vmatmul.mubr.msk.bf16.vlgmr.msra.gmra.mrb[12].mxu0 %vm610_vm3, %v848_v39  ;;  %v1221_v46 = vsel %vm610_vm3, %v1216_v44, 0 }
 0x17a   : > { %1917 = vmatpush3.bf16.xpose.msra.mxu0 %v979_v40  ;;  %1918 = vmatprep.mubr.msk.bf16.mxu0 %vm2108_vm0, %v2107_v1 }
 0x17b   : > { %1928 = vmatprep.subr.bf16.mxu0 %v2107_v1  ;;  %v1332_v51 = vpop.permute.xlu1 %1331 }
 0x17c   : > { %v1337_v47 = vpop.permute.xlu0 %1336 }
 0x17d   : > { %v1342_v49 = vsel %vm610_vm3, %v1337_v47, 0 }
 0x17f   : > { %v1453_v53 = vpop.permute.xlu1 %1452 }
 0x180   : > { %v1458_v50 = vpop.permute.xlu0 %1457 }
 0x181   : > { %1919 = vmatmul.mubr.msk.bf16.vlgmr.msra.gmra.mrb[16].mxu0 %vm610_vm3, %v969_v42  ;;  %v1463_v52 = vsel %vm610_vm3, %v1458_v50, 0 }
 0x182   : > { %1929 = vmatpush3.bf16.xpose.msra.mxu0 %v1100_v43  ;;  %1930 = vmatprep.mubr.msk.bf16.mxu0 %vm2108_vm0, %v2107_v1 }
 0x183   : > { %1940 = vmatprep.subr.bf16.mxu0 %v2107_v1 }
 0x189   : > { %1931 = vmatmul.mubr.msk.bf16.vlgmr.msra.gmra.mrb[20].mxu0 %vm610_vm3, %v1090_v45 }
 0x18a   : > { %1941 = vmatpush3.bf16.xpose.msra.mxu0 %v1221_v46  ;;  %1942 = vmatprep.mubr.msk.bf16.mxu0 %vm2108_vm0, %v2107_v1 }
 0x18b   : > { %1952 = vmatprep.subr.bf16.mxu0 %v2107_v1 }
 0x191   : > { %1943 = vmatmul.mubr.msk.bf16.vlgmr.msra.gmra.mrb[24].mxu0 %vm610_vm3, %v1211_v48 }
 0x192   : > { %1953 = vmatpush3.bf16.xpose.msra.mxu0 %v1342_v49  ;;  %1954 = vmatprep.mubr.msk.bf16.mxu0 %vm2108_vm0, %v2107_v1 }
 0x193   : > { %1964 = vmatprep.subr.bf16.mxu0 %v2107_v1 }
 0x199   : > { %1955 = vmatmul.mubr.msk.bf16.vlgmr.msra.gmra.mrb[28].mxu0 %vm610_vm3, %v1332_v51 }
 0x19a   : > { %1965 = vmatpush3.bf16.xpose.msra.mxu0 %v1463_v52  ;;  %1966 = vmatprep.mubr.msk.bf16.mxu0 %vm2108_vm0, %v2107_v1 }
 0x19b   : > { %1976 = vmatprep.subr.bf16.mxu0 %v2107_v1 }
 0x1a1   : > { %1967 = vmatmul.mubr.msk.bf16.vlgmr.msra.gmra.mrb[32].mxu0 %vm610_vm3, %v1453_v53 }
 0x1a2   : > { %1980 = vmatprep.mubr.msk.bf16.mxu0 %vm2108_vm0, %v2107_v1 }
 0x1cf   : > { %v651_v63 = vpop.f32.mrb[4].mxu0 }
 0x1d0   : > { %v657_v0 = vsel %vm2329_vm7, -1e+30, %v651_v63  ;;  %v1884_v2 = vpop.f32.mrb[5].mxu0 }
 0x1d1   : > { %v654_v3 = vpop.f32.mrb[6].mxu0  ;;  %v659_v4 = vsel %vm658_vm8, %v657_v0, -inf }
 0x1d2   : > { %660 = vmax.xlane.f32.xlu0 %v659_v4  ;;  %v1885_v5 = vpop.f32.mrb[7].mxu0 }
 0x244   : > { %v773_v6 = vpop.f32.mrb[8].mxu0 }
 0x245   : > { %v779_v8 = vsel %vm2329_vm7, -1e+30, %v773_v6  ;;  %v1896_v9 = vpop.f32.mrb[9].mxu0 }
 0x246   : > { %v776_v10 = vpop.f32.mrb[10].mxu0  ;;  %v780_v11 = vsel %vm658_vm8, %v779_v8, -inf }
 0x247   : > { %781 = vmax.xlane.f32.xlu1 %v780_v11  ;;  %v1897_v12 = vpop.f32.mrb[11].mxu0 }
 0x24c   : > { %v894_v13 = vpop.f32.mrb[12].mxu0 }
 0x24d   : > { %v900_v14 = vsel %vm2329_vm7, -1e+30, %v894_v13  ;;  %v1908_v15 = vpop.f32.mrb[13].mxu0 }
 0x24e   : > { %v897_v16 = vpop.f32.mrb[14].mxu0  ;;  %v901_v17 = vsel %vm658_vm8, %v900_v14, -inf }
 0x24f   : > { %902 = vmax.xlane.f32.xlu0 %v901_v17  ;;  %v1909_v18 = vpop.f32.mrb[15].mxu0 }
 0x254   : > { %v1015_v19 = vpop.f32.mrb[16].mxu0 }
 0x255   : > { %v2344_v20 = vsel %vm2329_vm7, -1e+30, %v1015_v19  ;;  %v1920_v21 = vpop.f32.mrb[17].mxu0 }
 0x256   : > { %v1018_v22 = vpop.f32.mrb[18].mxu0  ;;  %v1022_v25 = vsel %vm658_vm8, %v2344_v20, -inf }
 0x257   : > { %1023 = vmax.xlane.f32.xlu0 %v1022_v25  ;;  %v1921_v27 = vpop.f32.mrb[19].mxu0 }
 0x25c   : > { %v1136_v33 = vpop.f32.mrb[20].mxu0 }
 0x25d   : > { %v2350_v34 = vsel %vm2329_vm7, -1e+30, %v1136_v33  ;;  %v1932_v35 = vpop.f32.mrb[21].mxu0 }
 0x25e   : > { %v1139_v36 = vpop.f32.mrb[22].mxu0  ;;  %v1143_v37 = vsel %vm658_vm8, %v2350_v34, -inf }
 0x25f   : > { %1144 = vmax.xlane.f32.xlu1 %v1143_v37  ;;  %v1933_v38 = vpop.f32.mrb[23].mxu0  ;;  %v661_v56 = vpop.xlane.xlu0 %660 }
 0x260   : > { %v662_v57 = vsub.f32 %v657_v0, %v661_v56 }
 0x262   : > { %v663_v58 = vmul.f32 1.442695, %v662_v57 }
 0x264   : > { %v1257_v39 = vpop.f32.mrb[24].mxu0  ;;  %2047 = vpow2.f32 %v663_v58 }
 0x265   : > { %v2356_v40 = vsel %vm2329_vm7, -1e+30, %v1257_v39  ;;  %v1944_v41 = vpop.f32.mrb[25].mxu0 }
 0x266   : > { %v1260_v42 = vpop.f32.mrb[26].mxu0  ;;  %v1264_v43 = vsel %vm658_vm8, %v2356_v40, -inf }
 0x267   : > { %1265 = vmax.xlane.f32.xlu0 %v1264_v43  ;;  %v1945_v44 = vpop.f32.mrb[27].mxu0 }
 0x26c   : > { %v1378_v45 = vpop.f32.mrb[28].mxu0 }
 0x26d   : > { %v1384_v46 = vsel %vm2329_vm7, -1e+30, %v1378_v45  ;;  %v1956_v47 = vpop.f32.mrb[29].mxu0 }
 0x26e   : > { %v1381_v48 = vpop.f32.mrb[30].mxu0  ;;  %v1385_v49 = vsel %vm658_vm8, %v1384_v46, -inf  ;;  %v2369_v61 = vpop.eup %2047 }
 0x26f   : > { %1386 = vmax.xlane.f32.xlu1 %v1385_v49  ;;  %v1957_v50 = vpop.f32.mrb[31].mxu0 }
 0x274   : > { %v1499_v51 = vpop.f32.mrb[32].mxu0 }
 0x275   : > { %v1968_v52 = vpop.f32.mrb[33].mxu0  ;;  %v1505_v59 = vsel %vm2329_vm7, -1e+30, %v1499_v51 }
 0x276   : > { %v1502_v53 = vpop.f32.mrb[34].mxu0  ;;  %v1506_v60 = vsel %vm658_vm8, %v1505_v59, -inf }
 0x277   : > { %v1969_v54 = vpop.f32.mrb[35].mxu0 }
 0x27d   : > { %792 = vrot.lane.b32.xlu0 %v2267_v26, %s2117_s17  ;;  %v665_v26 = vsel %vm658_vm8, %v2369_v61, 0.0 }
 0x280   : > { %674 = vrot.lane.b32.xlu1 %v1792_v55, %s2118_s21 }
 0x29c   : > { %1507 = vmax.xlane.f32.xlu0 %v1506_v60 }
 0x2a4   : > { %666 = vadd.xlane.f32.xlu1 %v665_v26 }
 0x2d4   : > { %v782_v63 = vpop.xlane.xlu1 %781 }
 0x2d5   : > { %v783_v23 = vsub.f32 %v779_v8, %v782_v63 }
 0x2d7   : > { %v784_v2 = vmul.f32 1.442695, %v783_v23 }
 0x2d9   : > { %2049 = vpow2.f32 %v784_v2 }
 0x2dc   : > { %v903_v3 = vpop.xlane.xlu0 %902 }
 0x2dd   : > { %v904_v0 = vsub.f32 %v900_v14, %v903_v3 }
 0x2df   : > { %v905_v4 = vmul.f32 1.442695, %v904_v0 }
 0x2e1   : > { %2051 = vpow2.f32 %v905_v4 }
 0x2e3   : > { %v2373_v5 = vpop.eup %2049 }
 0x2e4   : > { %v786_v62 = vsel %vm658_vm8, %v2373_v5, 0.0  ;;  %v1024_v12 = vpop.xlane.xlu0 %1023 }
 0x2e5   : > { %787 = vadd.xlane.f32.xlu0 %v786_v62  ;;  %v1025_v14 = vsub.f32 %v2344_v20, %v1024_v12 }
 0x2e7   : > { %v1026_v15 = vmul.f32 1.442695, %v1025_v14 }
 0x2e9   : > { %2053 = vpow2.f32 %v1026_v15 }
 0x2eb   : > { %v2377_v6 = vpop.eup %2051 }
 0x2ec   : > { %v907_v9 = vsel %vm658_vm8, %v2377_v6, 0.0  ;;  %v1145_v10 = vpop.xlane.xlu1 %1144 }
 0x2ed   : > { %908 = vadd.xlane.f32.xlu1 %v907_v9  ;;  %v1146_v16 = vsub.f32 %v2350_v34, %v1145_v10 }
 0x2ef   : > { %v1147_v18 = vmul.f32 1.442695, %v1146_v16 }
 0x2f1   : > { %2055 = vpow2.f32 %v1147_v18 }
 0x2f3   : > { %v2388_v22 = vpop.eup %2053 }
 0x2f4   : > { %v1266_v17 = vpop.xlane.xlu0 %1265  ;;  %v1028_v25 = vsel %vm658_vm8, %v2388_v22, 0.0 }
 0x2f8   : > { %v793_v37 = vpop.permute.xlu0 %792 }
 0x2f9   : > { %v798_v47 = vsel %vm679_vm9, %v793_v37, 0 }
 0x2fb   : > { %913 = vrot.lane.b32.xlu0 %v2263_v24, %s2119_s22  ;;  %v1267_v24 = vsub.f32 %v2356_v40, %v1266_v17  ;;  %v2392_v20 = vpop.eup %2055  ;;  %s2130_s22 = smov 24  }
 0x2fc   : > { %v1387_v8 = vpop.xlane.xlu1 %1386  ;;  %v1149_v33 = vsel %vm658_vm8, %v2392_v20, 0.0 }
 0x2fd   : > { %v1388_v19 = vsub.f32 %v1384_v46, %v1387_v8 }
 0x2fe   : > { %1034 = vrot.lane.b32.xlu1 %v2273_v28, %s2120_s23  ;;  %v1268_v28 = vmul.f32 1.442695, %v1267_v24  ;;  %s2131_s23 = smov 28  }
 0x2ff   : > { %v1389_v21 = vmul.f32 1.442695, %v1388_v19 }
 0x300   : > { %v675_v11 = vpop.permute.xlu1 %674  ;;  %2057 = vpow2.f32 %v1268_v28 }
 0x301   : > { %v681_v13 = vsel %vm679_vm9, %v675_v11, 0  ;;  %2059 = vpow2.f32 %v1389_v21 }
 0x302   : > { %1887 = vmatpush3.bf16.msra.mxu1 %v681_v13 }
 0x303   : > { %1898 = vmatprep.subr.bf16.mxu1 %v2107_v1 }
 0x30a   : > { %v2394_v27 = vpop.eup %2057 }
 0x30b   : > { %v2398_v34 = vpop.eup %2059  ;;  %v1270_v35 = vsel %vm658_vm8, %v2394_v27, 0.0 }
 0x30c   : > { %v1391_v36 = vsel %vm658_vm8, %v2398_v34, 0.0 }
 0x31a   : > { %1029 = vadd.xlane.f32.xlu0 %v1028_v25 }
 0x31e   : > { %1150 = vadd.xlane.f32.xlu0 %v1149_v33 }
 0x322   : > { %1271 = vadd.xlane.f32.xlu1 %v1270_v35  ;;  %1392 = vadd.xlane.f32.xlu0 %v1391_v36 }
 0x329   : > { %v1508_v38 = vpop.xlane.xlu0 %1507 }
 0x32a   : > { %v1509_v39 = vsub.f32 %v1505_v59, %v1508_v38 }
 0x32c   : > { %v1510_v40 = vmul.f32 1.442695, %v1509_v39 }
 0x32e   : > { %2061 = vpow2.f32 %v1510_v40 }
 0x331   : > { %v667_v41 = vpop.xlane.xlu1 %666 }
 0x332   : > { %2063 = vrcp.f32 %v667_v41 }
 0x333   : > { %1276 = vrot.lane.b32.xlu1 %v2281_v30, %s2121_s24 }
 0x337   : > { %1397 = vrot.lane.b32.xlu1 %v2284_v31, %s2122_s25 }
 0x338   : > { %v2406_v42 = vpop.eup %2061 }
 0x339   : > { %v1512_v43 = vsel %vm658_vm8, %v2406_v42, 0.0 }
 0x33a   : > { %1513 = vadd.xlane.f32.xlu0 %v1512_v43 }
 0x33b   : > { %1518 = vrot.lane.b32.xlu1 %v2287_v32, %s2123_s26 }
 0x33c   : > { %v2064_v44 = vpop.eup %2063 }
 0x33d   : > { %v669_v45 = vmul.f32 %v2064_v44, %v2369_v61 }
 0x33f   : > { %v670_v46 = vpack.c.bf16 %v669_v45, %v669_v45 }
 0x341   : > { %1889 = vmatmul.mubr.msk.bf16.vlgmr.msra.gmra.mrb[4].mxu1 %vm658_vm8, %v670_v46 }
 0x342   : > { %1899 = vmatpush3.bf16.msra.mxu1 %v798_v47  ;;  %1900 = vmatprep.mubr.msk.bf16.mxu1 %vm2108_vm0, %v2107_v1 }
 0x343   : > { %1910 = vmatprep.subr.bf16.mxu1 %v2107_v1 }
 0x350   : > { %1155 = vrot.lane.b32.xlu0 %v2278_v29, %s2124_s27 }
 0x372   : > { %v788_v30 = vpop.xlane.xlu0 %787 }
 0x373   : > { %2065 = vrcp.f32 %v788_v30 }
 0x376   : > { %v914_v49 = vpop.permute.xlu0 %913 }
 0x377   : > { %v919_v51 = vsel %vm679_vm9, %v914_v49, 0 }
 0x37a   : > { %v909_v31 = vpop.xlane.xlu1 %908 }
 0x37b   : > { %2067 = vrcp.f32 %v909_v31 }
 0x37d   : > { %v2066_v32 = vpop.eup %2065 }
 0x37e   : > { %v790_v48 = vmul.f32 %v2066_v32, %v2373_v5  ;;  %v1035_v53 = vpop.permute.xlu1 %1034  ;;  %v2045_v32 = vld [vmem:[%s2497_s7] sm:$0xff]  }
 0x37f   : > { %v1040_v55 = vsel %vm679_vm9, %v1035_v53, 0  ;;  %1977 = vmatpush3.bf16.msra.mxu0 %v2045_v32 }
 0x380   : > { %v791_v50 = vpack.c.bf16 %v790_v48, %v790_v48  ;;  %v2046_v48 = vld [vmem:[%s2497_s7 + $0x8] sm:$0xff]   ;;  %1978 = vmatprep.subr.bf16.mxu0 %v2107_v1 }
 0x382   : > { %1901 = vmatmul.mubr.msk.bf16.vlgmr.msra.gmra.mrb[8].mxu1 %vm658_vm8, %v791_v50 }
 0x383   : > { %1911 = vmatpush3.bf16.msra.mxu1 %v919_v51  ;;  %1912 = vmatprep.mubr.msk.bf16.mxu1 %vm2108_vm0, %v2107_v1 }
 0x384   : > { %1922 = vmatprep.subr.bf16.mxu1 %v2107_v1  ;;  %1979 = vmatpush3.bf16.msra.mxu0 %v2046_v48 }
 0x385   : > { %v2068_v29 = vpop.eup %2067 }
 0x386   : > { %v911_v52 = vmul.f32 %v2068_v29, %v2377_v6 }
 0x388   : > { %v912_v54 = vpack.c.bf16 %v911_v52, %v911_v52 }
 0x38a   : > { %1913 = vmatmul.mubr.msk.bf16.vlgmr.msra.gmra.mrb[12].mxu1 %vm658_vm8, %v912_v54 }
 0x38b   : > { %1923 = vmatpush3.bf16.msra.mxu1 %v1040_v55  ;;  %1924 = vmatprep.mubr.msk.bf16.mxu1 %vm2108_vm0, %v2107_v1 }
 0x38c   : > { %1934 = vmatprep.subr.bf16.mxu1 %v2107_v1 }
 0x3a7   : > { %v1030_v56 = vpop.xlane.xlu0 %1029 }
 0x3a8   : > { %2069 = vrcp.f32 %v1030_v56 }
 0x3ab   : > { %v1151_v60 = vpop.xlane.xlu0 %1150 }
 0x3ac   : > { %2071 = vrcp.f32 %v1151_v60 }
 0x3af   : > { %v1272_v61 = vpop.xlane.xlu1 %1271  ;;  %v1393_v26 = vpop.xlane.xlu0 %1392 }
 0x3b0   : > { %2073 = vrcp.f32 %v1272_v61 }
 0x3b1   : > { %2075 = vrcp.f32 %v1393_v26 }
 0x3b2   : > { %v2070_v57 = vpop.eup %2069 }
 0x3b3   : > { %v1032_v58 = vmul.f32 %v2070_v57, %v2388_v22  ;;  %v1277_v4 = vpop.permute.xlu1 %1276 }
 0x3b4   : > { %v1282_v6 = vsel %vm679_vm9, %v1277_v4, 0 }
 0x3b5   : > { %v1033_v59 = vpack.c.bf16 %v1032_v58, %v1032_v58 }
 0x3b6   : > { %v2072_v63 = vpop.eup %2071 }
 0x3b7   : > { %1925 = vmatmul.mubr.msk.bf16.vlgmr.msra.gmra.mrb[16].mxu1 %vm658_vm8, %v1033_v59  ;;  %v1153_v2 = vmul.f32 %v2072_v63, %v2392_v20  ;;  %v1398_v10 = vpop.permute.xlu1 %1397 }
 0x3b8   : > { %1936 = vmatprep.mubr.msk.bf16.mxu1 %vm2108_vm0, %v2107_v1  ;;  %v1403_v12 = vsel %vm679_vm9, %v1398_v10, 0 }
 0x3b9   : > { %v1154_v5 = vpack.c.bf16 %v1153_v2, %v1153_v2 }
 0x3ba   : > { %v2074_v62 = vpop.eup %2073 }
 0x3bb   : > { %v1274_v9 = vmul.f32 %v2074_v62, %v2394_v27  ;;  %v2076_v11 = vpop.eup %2075  ;;  %v1519_v14 = vpop.permute.xlu1 %1518 }
 0x3bc   : > { %v1395_v13 = vmul.f32 %v2076_v11, %v2398_v34  ;;  %v1524_v17 = vsel %vm679_vm9, %v1519_v14, 0 }
 0x3bd   : > { %v1275_v8 = vpack.c.bf16 %v1274_v9, %v1274_v9 }
 0x3be   : > { %v1396_v15 = vpack.c.bf16 %v1395_v13, %v1395_v13 }
 0x3c7   : > { %v1514_v23 = vpop.xlane.xlu0 %1513 }
 0x3c8   : > { %2077 = vrcp.f32 %v1514_v23  ;;  %v1815_v23 = vld [vmem:[%s2498_s8] ss:$0 sm:$0xff] }
 0x3cb   : > { %v1156_v3 = vpop.permute.xlu0 %1155 }
 0x3cc   : > { %v1161_v0 = vsel %vm679_vm9, %v1156_v3, 0 }
 0x3cd   : > { %1935 = vmatpush3.bf16.msra.mxu1 %v1161_v0 }
 0x3ce   : > { %1946 = vmatprep.subr.bf16.mxu1 %v2107_v1 }
 0x3d0   : > { %1937 = vmatmul.mubr.msk.bf16.vlgmr.msra.gmra.mrb[20].mxu1 %vm658_vm8, %v1154_v5 }
 0x3d1   : > { %1947 = vmatpush3.bf16.msra.mxu1 %v1282_v6  ;;  %1948 = vmatprep.mubr.msk.bf16.mxu1 %vm2108_vm0, %v2107_v1 }
 0x3d2   : > { %1958 = vmatprep.subr.bf16.mxu1 %v2107_v1  ;;  %v2078_v16 = vpop.eup %2077 }
 0x3d3   : > { %v1516_v24 = vmul.f32 %v2078_v16, %v2406_v42 }
 0x3d5   : > { %v1517_v18 = vpack.c.bf16 %v1516_v24, %v1516_v24 }
 0x3d8   : > { %1949 = vmatmul.mubr.msk.bf16.vlgmr.msra.gmra.mrb[24].mxu1 %vm658_vm8, %v1275_v8 }
 0x3d9   : > { %1959 = vmatpush3.bf16.msra.mxu1 %v1403_v12  ;;  %1960 = vmatprep.mubr.msk.bf16.mxu1 %vm2108_vm0, %v2107_v1 }
 0x3da   : > { %1970 = vmatprep.subr.bf16.mxu1 %v2107_v1 }
 0x3e0   : > { %1961 = vmatmul.mubr.msk.bf16.vlgmr.msra.gmra.mrb[28].mxu1 %vm658_vm8, %v1396_v15 }
 0x3e1   : > { %1971 = vmatpush3.bf16.msra.mxu1 %v1524_v17  ;;  %1972 = vmatprep.mubr.msk.bf16.mxu1 %vm2108_vm0, %v2107_v1  ;;  %vm1570_vm0 = vcmask 261344  }
 0x3e8   : > { %1973 = vmatmul.mubr.msk.bf16.vlgmr.msra.gmra.mrb[32].mxu1 %vm658_vm8, %v1517_v18 }
 0x414   : > { %v717_v19 = vpop.f32.mrb[4].mxu1 }
 0x415   : > { %723 = vst.msk [vmem:[#allocation3] sm:$0xff] %vm610_vm3, %v717_v19  ;;  %v1890_v28 = vpop.f32.mrb[5].mxu1  ;;  %v1819_v19 = vld [vmem:[%s2499_s9] ss:$0 sm:$0xff] }
 0x416   : > { %v720_v21 = vpop.f32.mrb[6].mxu1 }
 0x417   : > { %v1891_v22 = vpop.f32.mrb[7].mxu1 }
 0x418   : > { %v1820_v22 = vld [vmem:[%s2500_s10] ss:$0 sm:$0xff] }
 0x455   : > { %v834_v25 = vpop.f32.mrb[8].mxu1 }
 0x456   : > { %841 = vrot.lane.b32.xlu1 %v834_v25, %s2125_s28  ;;  %v1902_v20 = vpop.f32.mrb[9].mxu1 }
 0x457   : > { %v837_v27 = vpop.f32.mrb[10].mxu1 }
 0x458   : > { %v1903_v33 = vpop.f32.mrb[11].mxu1 }
 0x45d   : > { %v955_v34 = vpop.f32.mrb[12].mxu1 }
 0x45e   : > { %962 = vrot.lane.b32.xlu1 %v955_v34, %s2126_s30  ;;  %v1914_v35 = vpop.f32.mrb[13].mxu1 }
 0x45f   : > { %v958_v36 = vpop.f32.mrb[14].mxu1 }
 0x460   : > { %v1915_v37 = vpop.f32.mrb[15].mxu1 }
 0x48a   : > { %v1076_v38 = vpop.f32.mrb[16].mxu1 }
 0x48b   : > { %1083 = vrot.lane.b32.xlu0 %v1076_v38, %s2127_s12  ;;  %v1926_v39 = vpop.f32.mrb[17].mxu1 }
 0x48c   : > { %v1079_v40 = vpop.f32.mrb[18].mxu1 }
 0x48d   : > { %v1927_v41 = vpop.f32.mrb[19].mxu1 }
 0x4a3   : > { %v1197_v42 = vpop.f32.mrb[20].mxu1 }
 0x4a4   : > { %1204 = vrot.lane.b32.xlu1 %v1197_v42, %s2128_s13  ;;  %v1938_v43 = vpop.f32.mrb[21].mxu1 }
 0x4a5   : > { %v1200_v44 = vpop.f32.mrb[22].mxu1 }
 0x4a6   : > { %v1939_v45 = vpop.f32.mrb[23].mxu1 }
 0x4ab   : > { %v1318_v46 = vpop.f32.mrb[24].mxu1 }
 0x4ac   : > { %1325 = vrot.lane.b32.xlu0 %v1318_v46, %s2129_s14  ;;  %v1950_v47 = vpop.f32.mrb[25].mxu1  ;;  %s443_s14 = scalar_lea.vmem %s2501_s11, %s2232_s29 }
 0x4ad   : > { %v1321_v30 = vpop.f32.mrb[26].mxu1 }
 0x4ae   : > { %v1951_v31 = vpop.f32.mrb[27].mxu1 }
 0x4b3   : > { %v1439_v49 = vpop.f32.mrb[28].mxu1 }
 0x4b4   : > { %1446 = vrot.lane.b32.xlu1 %v1439_v49, %s2130_s22  ;;  %v1962_v50 = vpop.f32.mrb[29].mxu1 }
 0x4b5   : > { %v1442_v51 = vpop.f32.mrb[30].mxu1 }
 0x4b6   : > { %v1963_v29 = vpop.f32.mrb[31].mxu1 }
 0x4bb   : > { %v1560_v52 = vpop.f32.mrb[32].mxu1 }
 0x4bc   : > { %1567 = vrot.lane.b32.xlu0 %v1560_v52, %s2131_s23  ;;  %v1974_v53 = vpop.f32.mrb[33].mxu1 }
 0x4bd   : > { %v1563_v54 = vpop.f32.mrb[34].mxu1 }
 0x4be   : > { %v1975_v55 = vpop.f32.mrb[35].mxu1 }
 0x4c8   : > { %v842_v56 = vpop.permute.xlu1 %841 }
 0x4c9   : > { %845 = vst.msk [vmem:[#allocation3] sm:$0xff] %vm844_vm10, %v842_v56 }
 0x4d0   : > { %v963_v57 = vpop.permute.xlu1 %962 }
 0x4d1   : > { %966 = vst.msk [vmem:[#allocation3] sm:$0xff] %vm965_vm11, %v963_v57 }
 0x4fd   : > { %v1084_v1 = vpop.permute.xlu0 %1083 }
 0x4fe   : > { %1087 = vst.msk [vmem:[#allocation3] sm:$0xff] %vm1086_vm12, %v1084_v1 }
 0x516   : > { %v1205_v58 = vpop.permute.xlu1 %1204 }
 0x517   : > { %1208 = vst.msk [vmem:[#allocation3] sm:$0xff] %vm1207_vm13, %v1205_v58 }
 0x51e   : > { %v1326_v59 = vpop.permute.xlu0 %1325 }
 0x51f   : > { %1329 = vst.msk [vmem:[#allocation3] sm:$0xff] %vm1328_vm14, %v1326_v59 }
 0x526   : > { %v1447_v60 = vpop.permute.xlu1 %1446 }
 0x527   : > { %1450 = vst.msk [vmem:[#allocation3] sm:$0xff] %vm1449_vm15, %v1447_v60 }
 0x52e   : > { %v1568_v61 = vpop.permute.xlu0 %1567 }
 0x52f   : > { %1571 = vst.msk [vmem:[#allocation3] sm:$0xff] %vm1570_vm0, %v1568_v61 }
 0x536   : > { %v1572_v26 = vld [vmem:[#allocation3] sm:$0xff] }
 0x537   : > { %v1573_v63 = vpack.c.bf16 %v1572_v26, %v1572_v26 }
 0x539   : > { %1981 = vmatmul.mubr.msk.bf16.vlgmr.msra.gmra.mrb[36].mxu0 %vm474_vm1, %v1573_v63 }
 0x60c   : > { %v1634_v2 = vpop.f32.mrb[36].mxu0 }
 0x60d   : > { %v1635_v3 = vadd.f32 %v1815_v23, %v1634_v2  ;;  %v1982_v0 = vpop.f32.mrb[37].mxu0 }
 0x60e   : > { %v1637_v4 = vpop.f32.mrb[38].mxu0 }
 0x60f   : > { %v1983_v5 = vpop.f32.mrb[39].mxu0  ;;  %v1640_v62 = vadd.f32 %v1635_v3, %v2244_v7 }
 0x611   : > { %v1641_v6 = vsel %vm474_vm1, %v1640_v62, 0.0 }
 0x612   : > { %1642 = vadd.xlane.f32.xlu1 %v1641_v6 }
 0x69f   : > { %v1643_v9 = vpop.xlane.xlu1 %1642 }
 0x6a0   : > { %v1645_v10 = vmul.f32 0.03125, %v1643_v9 }
 0x6a2   : > { %v1646_v8 = vsub.f32 %v1640_v62, %v1645_v10 }
 0x6a4   : > { %v1647_v11 = vmul.f32 %v1646_v8, %v1646_v8  ;;  %v1660_v28 = vmul.f32 %v1819_v19, %v1646_v8 }
 0x6a6   : > { %v1648_v12 = vsel %vm474_vm1, %v1647_v11, 0.0 }
 0x6a7   : > { %1649 = vadd.xlane.f32.xlu0 %v1648_v12 }
 0x734   : > { %v1650_v13 = vpop.xlane.xlu0 %1649 }
 0x735   : > { %v1652_v14 = vmul.f32 0.032258064, %v1650_v13 }
 0x737   : > { %2079 = vrsqrt.f32 %v1652_v14  ;;  %vm1663_vm2 = vcmp.eq.f32.partialorder %v1652_v14, inf  ;;  %v1666_v17 = vand.u32 2147483648, %v1652_v14  ;;  %vm1665_vm3 = vcmp.eq.f32.partialorder %v1652_v14, 0.0 }
 0x741   : > { %v2080_v15 = vpop.eup %2079 }
 0x742   : > { %v1662_v16 = vmul.f32 %v2080_v15, %v1652_v14 }
 0x744   : > { %v1664_v24 = vsel %vm1663_vm2, %v1652_v14, %v1662_v16 }
 0x745   : > { %v1667_v7 = vsel %vm1665_vm3, %v1666_v17, %v1664_v24 }
 0x746   : > { %v1668_v18 = vadd.f32 1e-06, %v1667_v7 }
 0x748   : > { %2081 = vrcp.f32 %v1668_v18 }
 0x752   : > { %v2082_v21 = vpop.eup %2081 }
 0x753   : > { %v1670_v25 = vmul.f32 %v2082_v21, %v1660_v28 }
 0x755   : > { %v1678_v20 = vadd.f32 %v1820_v22, %v1670_v25 }
 0x757   : > { %1679 = vst.msk [vmem:[%s443_s14] sm:$0xff] %vm474_vm1, %v1678_v20 }
 0x758 PF: > { %s21_s19 = sadd.s32 1, %s2105_s19   ;;  %s2504_s17 = smov %s2101_s18 }
 0x759   : > { %p18_p5 = scmp.ge.s32.totalorder %s21_s19, 4   ;;  %s2505_s18 = smov %s2507_s20 }
 0x75b   :  { %20 = sbr.rel (!%p18_p5) target bundleno = 2 (0x2), region = 104 }

</bundles_post_ra>
